<compile_context>
chip_gen: v7x
topology: tpu7x:2x2x1
jax: 0.10.0
libtpu: 0.0.40
codegen_flags: <defaults>
</compile_context>

<pallas_src>
import functools

import jax
import jax.numpy as jnp
from jax.experimental import pallas as pl
from jax.experimental.pallas import tpu as pltpu

LANE = 128
_VMEM_LIMIT = 32 * 1024 * 1024  # safe on v5e/v6e/v7x; tiles here are far smaller


def _round_up(x, m):
    return (x + m - 1) // m * m


def _pick_tile_h(h, w, target_rows=512):
    """Largest divisor of h whose row tile (tile_h * w) stays <= target_rows."""
    best = 1
    for th in range(1, h + 1):
        if h % th == 0 and th * w <= target_rows:
            best = th
    return best


# ----------------------------------------------------------------------------
# Pass 1: 3x3 conv from a halo row band + per-tile BatchNorm partial statistics
# ----------------------------------------------------------------------------
def _conv_stats_kernel(x_ref, w_ref, o_ref, stat_ref, *, tile_h, width):
    # x_ref   : (tile_h + 2, width + 2, cin_p)  bf16  spatially padded halo tile
    # w_ref   : (9, cin_p, cout_p)              bf16  taps, k = dy*3 + dx
    # o_ref   : (tile_h * width, cout_p)        bf16  un-normalized conv output
    # stat_ref: (2, cout_p)                     f32   [sum, sum of squares]
    cin_p = x_ref.shape[-1]
    cout_p = w_ref.shape[-1]
    m = tile_h * width

    acc = jnp.zeros((m, cout_p), jnp.float32)
    for dy in range(3):          # statically unrolled over the 9 taps
        for dx in range(3):
            patch = x_ref[dy:dy + tile_h, dx:dx + width, :].reshape(m, cin_p)
            acc = acc + jnp.dot(patch, w_ref[dy * 3 + dx],
                                preferred_element_type=jnp.float32)

    o_ref[...] = acc.astype(o_ref.dtype)
    s1 = jnp.sum(acc, axis=0, keepdims=True)
    s2 = jnp.sum(acc * acc, axis=0, keepdims=True)
    stat_ref[...] = jnp.concatenate([s1, s2], axis=0)


# ----------------------------------------------------------------------------
# Pass 2: fused BatchNorm affine (scale * x + shift) + ReLU
# ----------------------------------------------------------------------------
def _bn_relu_kernel(x_ref, scale_ref, shift_ref, o_ref):
    y = x_ref[...].astype(jnp.float32) * scale_ref[...] + shift_ref[...]
    o_ref[...] = jnp.maximum(y, 0.0).astype(o_ref.dtype)


def conv_bn_relu_block(x_nhwc, w_taps, gamma_p, beta_p, *, eps=1e-5, tile_h=None):
    """Conv3x3(pad=1) + BatchNorm2d(training batch stats) + ReLU.

    x_nhwc : (N, H, W, cin_p) bf16, channel axis already padded to 128*k
    w_taps : (9, cin_p, cout_p) bf16
    gamma_p, beta_p : (cout_p,) f32
    returns (N, H, W, cout_p) bf16
    """
    n, h, w, cin_p = x_nhwc.shape
    cout_p = w_taps.shape[-1]
    if tile_h is None:
        tile_h = _pick_tile_h(h, w)
    assert h % tile_h == 0, (h, tile_h)
    n_tiles = h // tile_h
    tile_m = tile_h * w
    n_steps = n * n_tiles

    # Spatial zero padding (padding=1) + overlapping row bands, so each grid
    # step sees its halo through a plain Blocked BlockSpec.  Duplication is
    # only 2 rows per tile_h rows (vs. 9x for a materialized im2col).
    xp = jnp.pad(x_nhwc, ((0, 0), (1, 1), (1, 1), (0, 0)))
    x_tiles = jnp.stack(
        [xp[:, t * tile_h: t * tile_h + tile_h + 2] for t in range(n_tiles)],
        axis=1,
    ).reshape(n_steps, tile_h + 2, w + 2, cin_p)

    conv_kernel = functools.partial(_conv_stats_kernel, tile_h=tile_h, width=w)
    conv_out, part_stats = pl.pallas_call(
        conv_kernel,
        grid=(n_steps,),
        in_specs=[
            pl.BlockSpec((None, tile_h + 2, w + 2, cin_p),
                         lambda i: (i, 0, 0, 0)),
            pl.BlockSpec((9, cin_p, cout_p), lambda i: (0, 0, 0)),
        ],
        out_specs=(
            pl.BlockSpec((None, tile_m, cout_p), lambda i: (i, 0, 0)),
            pl.BlockSpec((None, 2, cout_p), lambda i: (i, 0, 0)),
        ),
        out_shape=(
            jax.ShapeDtypeStruct((n_steps, tile_m, cout_p), jnp.bfloat16),
            jax.ShapeDtypeStruct((n_steps, 2, cout_p), jnp.float32),
        ),
        compiler_params=pltpu.CompilerParams(
            dimension_semantics=("parallel",),
            vmem_limit_bytes=_VMEM_LIMIT,
        ),
    )(x_tiles, w_taps)

    # Tiny cross-tile reduction + BN fold into one per-channel scale/shift.
    m_total = n * h * w
    stats = jnp.sum(part_stats, axis=0)                        # (2, cout_p) f32
    mean = stats[0] / m_total
    var = jnp.maximum(stats[1] / m_total - mean * mean, 0.0)   # biased variance
    scale = gamma_p * jax.lax.rsqrt(var + eps)
    shift = beta_p - mean * scale

    y = pl.pallas_call(
        _bn_relu_kernel,
        grid=(n_steps,),
        in_specs=[
            pl.BlockSpec((None, tile_m, cout_p), lambda i: (i, 0, 0)),
            pl.BlockSpec((1, cout_p), lambda i: (0, 0)),
            pl.BlockSpec((1, cout_p), lambda i: (0, 0)),
        ],
        out_specs=pl.BlockSpec((None, tile_m, cout_p), lambda i: (i, 0, 0)),
        out_shape=jax.ShapeDtypeStruct((n_steps, tile_m, cout_p), jnp.bfloat16),
        compiler_params=pltpu.CompilerParams(
            dimension_semantics=("parallel",),
            vmem_limit_bytes=_VMEM_LIMIT,
        ),
    )(conv_out, scale.reshape(1, cout_p), shift.reshape(1, cout_p))

    return y.reshape(n, h, w, cout_p)


# ----------------------------------------------------------------------------
# Parameter preparation (PyTorch layout -> padded bf16 tap layout)
# ----------------------------------------------------------------------------
def _torch_conv_to_taps(w_oihw, cin_p, cout_p):
    """(Cout, Cin, 3, 3) -> zero-padded bf16 (9, cin_p, cout_p), tap k = dy*3+dx."""
    cout, cin, kh, kw = w_oihw.shape
    assert kh == 3 and kw == 3
    taps = jnp.transpose(w_oihw, (2, 3, 1, 0)).reshape(kh * kw, cin, cout)
    taps = jnp.pad(taps, ((0, 0), (0, cin_p - cin), (0, cout_p - cout)))
    return taps.astype(jnp.bfloat16)


def prepare_params(w1_oihw, b1, g1, bn_b1, w2_oihw, b2, g2, bn_b2):
    """Convert PyTorch DoubleConv parameters to the kernel layout.

    Conv biases b1/b2 are accepted for API parity but intentionally unused: a
    per-channel constant added right before training-mode BatchNorm cancels in
    the mean subtraction and does not affect the forward output.
    """
    del b1, b2
    cout, cin = w1_oihw.shape[0], w1_oihw.shape[1]
    cin_p = _round_up(cin, LANE)
    cout_p = _round_up(cout, LANE)
    pad_c = cout_p - cout
    return dict(
        w1=_torch_conv_to_taps(w1_oihw, cin_p, cout_p),
        g1=jnp.pad(g1.astype(jnp.float32), (0, pad_c), constant_values=1.0),
        bn_b1=jnp.pad(bn_b1.astype(jnp.float32), (0, pad_c)),
        w2=_torch_conv_to_taps(w2_oihw, cout_p, cout_p),
        g2=jnp.pad(g2.astype(jnp.float32), (0, pad_c), constant_values=1.0),
        bn_b2=jnp.pad(bn_b2.astype(jnp.float32), (0, pad_c)),
        cin=cin, cout=cout, cin_p=cin_p, cout_p=cout_p,
    )


def double_conv(x_nchw, params, *, eps=1e-5, tile_h=None):
    """DoubleConv forward: (N, Cin, H, W) f32 -> (N, Cout, H, W) f32."""
    n, cin, h, w = x_nchw.shape
    assert cin == params["cin"]
    x = jnp.transpose(x_nchw, (0, 2, 3, 1))                       # NCHW -> NHWC
    x = jnp.pad(x, ((0, 0), (0, 0), (0, 0), (0, params["cin_p"] - cin)))
    x = x.astype(jnp.bfloat16)
    y = conv_bn_relu_block(x, params["w1"], params["g1"], params["bn_b1"],
                           eps=eps, tile_h=tile_h)
    y = conv_bn_relu_block(y, params["w2"], params["g2"], params["bn_b2"],
                           eps=eps, tile_h=tile_h)
    y = y[..., :params["cout"]].astype(jnp.float32)
    return jnp.transpose(y, (0, 3, 1, 2))                         # NHWC -> NCHW


# ----------------------------------------------------------------------------
# Pure-JAX f32 reference (keeps the conv bias; it cancels under training BN)
# ----------------------------------------------------------------------------
def _ref_block(x_nchw, w_oihw, b, gamma, beta, eps=1e-5):
    y = jax.lax.conv_general_dilated(
        x_nchw, w_oihw, (1, 1), "SAME",
        dimension_numbers=("NCHW", "OIHW", "NCHW"),
    )
    y = y + b[None, :, None, None]
    mean = jnp.mean(y, axis=(0, 2, 3), keepdims=True)
    var = jnp.mean((y - mean) ** 2, axis=(0, 2, 3), keepdims=True)
    y = (y - mean) * jax.lax.rsqrt(var + eps)
    y = y * gamma[None, :, None, None] + beta[None, :, None, None]
    return jnp.maximum(y, 0.0)


def double_conv_ref(x_nchw, raw):
    y = _ref_block(x_nchw, raw["w1_oihw"], raw["b1"], raw["g1"], raw["bn_b1"])
    y = _ref_block(y, raw["w2_oihw"], raw["b2"], raw["g2"], raw["bn_b2"])
    return y


if __name__ == "__main__":
    N, CIN, COUT, H, W = 2, 4, 8, 16, 16

    key = jax.random.PRNGKey(0)
    k = jax.random.split(key, 5)
    x = jax.random.normal(k[0], (N, CIN, H, W), jnp.float32)

    # Deterministic synthetic parameters in PyTorch shapes.
    w1_oihw = 0.1 * jax.random.normal(k[1], (COUT, CIN, 3, 3), jnp.float32)
    b1 = 0.1 * jax.random.normal(k[2], (COUT,), jnp.float32)
    w2_oihw = 0.1 * jax.random.normal(k[3], (COUT, COUT, 3, 3), jnp.float32)
    b2 = 0.1 * jax.random.normal(k[4], (COUT,), jnp.float32)
    g1 = jnp.ones((COUT,), jnp.float32)      # BatchNorm default init: gamma=1
    bn_b1 = jnp.zeros((COUT,), jnp.float32)  # beta=0
    g2 = jnp.ones((COUT,), jnp.float32)
    bn_b2 = jnp.zeros((COUT,), jnp.float32)

    params = prepare_params(w1_oihw, b1, g1, bn_b1, w2_oihw, b2, g2, bn_b2)
    raw = dict(w1_oihw=w1_oihw, b1=b1, g1=g1, bn_b1=bn_b1,
               w2_oihw=w2_oihw, b2=b2, g2=g2, bn_b2=bn_b2)

    # tile_h=8 -> 2 row tiles per image -> exercises the multi-tile grid and
    # the cross-tile BatchNorm partial-sum combination.
    out = jax.block_until_ready(double_conv(x, params, tile_h=8))
    assert out.shape == (N, COUT, H, W), out.shape
    assert out.dtype == jnp.float32

    ref = jax.block_until_ready(double_conv_ref(x, raw))
    max_err = float(jnp.max(jnp.abs(out - ref)))
    # bf16 MXU inputs (f32 accumulation) -> relax tolerance vs. the f32 ref.
    assert jnp.allclose(out, ref, atol=5e-2, rtol=5e-2), max_err

    print("KERNEL_OK")
</pallas_src>

<mosaic_0001>
module attributes {stable_mosaic.version = 11 : i64} {
  func.func @_conv_stats_kernel(%arg0: i32, %arg1: memref<1x10x18x128xbf16, #tpu.memory_space<vmem>>, %arg2: memref<9x128x128xbf16, #tpu.memory_space<vmem>>, %arg3: memref<1x128x128xbf16, #tpu.memory_space<vmem>>, %arg4: memref<1x2x128xf32, #tpu.memory_space<vmem>>) attributes {dimension_semantics = [#tpu.dimension_semantics<parallel>], iteration_bounds = array<i64: 4>, scalar_prefetch = 0 : i64, scratch_operands = 0 : i64, tpu.core_type = #tpu.core_type<tc>, window_params = [{transform_indices = @transform_0, window_bounds = array<i64: 1, 10, 18, 128>}, {pipeline_mode = #tpu.pipeline_mode<synchronous>, transform_indices = @transform_1, window_bounds = array<i64: 9, 128, 128>}, {transform_indices = @transform_2, window_bounds = array<i64: 1, 128, 128>}, {transform_indices = @transform_3, window_bounds = array<i64: 1, 2, 128>}]} {
    %cst = arith.constant 0.000000e+00 : f32
    %0 = vector.broadcast %cst : f32 to vector<128x128xf32>
    %c0 = arith.constant 0 : index
    %c0_0 = arith.constant 0 : index
    %c0_1 = arith.constant 0 : index
    %c0_2 = arith.constant 0 : index
    %1 = vector.load %arg1[%c0, %c0_0, %c0_1, %c0_2] : memref<1x10x18x128xbf16, #tpu.memory_space<vmem>>, vector<1x8x16x128xbf16>
    %2 = vector.shape_cast %1 : vector<1x8x16x128xbf16> to vector<8x16x128xbf16>
    %3 = vector.shape_cast %2 : vector<8x16x128xbf16> to vector<128x128xbf16>
    %c0_3 = arith.constant 0 : index
    %c0_4 = arith.constant 0 : index
    %c0_5 = arith.constant 0 : index
    %4 = vector.load %arg2[%c0_3, %c0_4, %c0_5] : memref<9x128x128xbf16, #tpu.memory_space<vmem>>, vector<1x128x128xbf16>
    %5 = vector.shape_cast %4 : vector<1x128x128xbf16> to vector<128x128xbf16>
    %cst_6 = arith.constant dense<0.000000e+00> : vector<128x128xf32>
    %6 = tpu.matmul %3, %5, %cst_6 {dimension_numbers = #tpu.dot_dimension_numbers<[1], [0], [0], [1], [0, 0, 1, 1], [], []>} : vector<128x128xbf16>, vector<128x128xbf16>, vector<128x128xf32> -> vector<128x128xf32>
    %7 = arith.addf %0, %6 : vector<128x128xf32>
    %c0_7 = arith.constant 0 : index
    %c0_8 = arith.constant 0 : index
    %c1 = arith.constant 1 : index
    %c0_9 = arith.constant 0 : index
    %8 = vector.load %arg1[%c0_7, %c0_8, %c1, %c0_9] : memref<1x10x18x128xbf16, #tpu.memory_space<vmem>>, vector<1x8x16x128xbf16>
    %9 = vector.shape_cast %8 : vector<1x8x16x128xbf16> to vector<8x16x128xbf16>
    %10 = vector.shape_cast %9 : vector<8x16x128xbf16> to vector<128x128xbf16>
    %c1_10 = arith.constant 1 : index
    %c0_11 = arith.constant 0 : index
    %c0_12 = arith.constant 0 : index
    %11 = vector.load %arg2[%c1_10, %c0_11, %c0_12] : memref<9x128x128xbf16, #tpu.memory_space<vmem>>, vector<1x128x128xbf16>
    %12 = vector.shape_cast %11 : vector<1x128x128xbf16> to vector<128x128xbf16>
    %cst_13 = arith.constant dense<0.000000e+00> : vector<128x128xf32>
    %13 = tpu.matmul %10, %12, %cst_13 {dimension_numbers = #tpu.dot_dimension_numbers<[1], [0], [0], [1], [0, 0, 1, 1], [], []>} : vector<128x128xbf16>, vector<128x128xbf16>, vector<128x128xf32> -> vector<128x128xf32>
    %14 = arith.addf %7, %13 : vector<128x128xf32>
    %c0_14 = arith.constant 0 : index
    %c0_15 = arith.constant 0 : index
    %c2 = arith.constant 2 : index
    %c0_16 = arith.constant 0 : index
    %15 = vector.load %arg1[%c0_14, %c0_15, %c2, %c0_16] : memref<1x10x18x128xbf16, #tpu.memory_space<vmem>>, vector<1x8x16x128xbf16>
    %16 = vector.shape_cast %15 : vector<1x8x16x128xbf16> to vector<8x16x128xbf16>
    %17 = vector.shape_cast %16 : vector<8x16x128xbf16> to vector<128x128xbf16>
    %c2_17 = arith.constant 2 : index
    %c0_18 = arith.constant 0 : index
    %c0_19 = arith.constant 0 : index
    %18 = vector.load %arg2[%c2_17, %c0_18, %c0_19] : memref<9x128x128xbf16, #tpu.memory_space<vmem>>, vector<1x128x128xbf16>
    %19 = vector.shape_cast %18 : vector<1x128x128xbf16> to vector<128x128xbf16>
    %cst_20 = arith.constant dense<0.000000e+00> : vector<128x128xf32>
    %20 = tpu.matmul %17, %19, %cst_20 {dimension_numbers = #tpu.dot_dimension_numbers<[1], [0], [0], [1], [0, 0, 1, 1], [], []>} : vector<128x128xbf16>, vector<128x128xbf16>, vector<128x128xf32> -> vector<128x128xf32>
    %21 = arith.addf %14, %20 : vector<128x128xf32>
    %c0_21 = arith.constant 0 : index
    %c1_22 = arith.constant 1 : index
    %c0_23 = arith.constant 0 : index
    %c0_24 = arith.constant 0 : index
    %22 = vector.load %arg1[%c0_21, %c1_22, %c0_23, %c0_24] : memref<1x10x18x128xbf16, #tpu.memory_space<vmem>>, vector<1x8x16x128xbf16>
    %23 = vector.shape_cast %22 : vector<1x8x16x128xbf16> to vector<8x16x128xbf16>
    %24 = vector.shape_cast %23 : vector<8x16x128xbf16> to vector<128x128xbf16>
    %c3 = arith.constant 3 : index
    %c0_25 = arith.constant 0 : index
    %c0_26 = arith.constant 0 : index
    %25 = vector.load %arg2[%c3, %c0_25, %c0_26] : memref<9x128x128xbf16, #tpu.memory_space<vmem>>, vector<1x128x128xbf16>
    %26 = vector.shape_cast %25 : vector<1x128x128xbf16> to vector<128x128xbf16>
    %cst_27 = arith.constant dense<0.000000e+00> : vector<128x128xf32>
    %27 = tpu.matmul %24, %26, %cst_27 {dimension_numbers = #tpu.dot_dimension_numbers<[1], [0], [0], [1], [0, 0, 1, 1], [], []>} : vector<128x128xbf16>, vector<128x128xbf16>, vector<128x128xf32> -> vector<128x128xf32>
    %28 = arith.addf %21, %27 : vector<128x128xf32>
    %c0_28 = arith.constant 0 : index
    %c1_29 = arith.constant 1 : index
    %c1_30 = arith.constant 1 : index
    %c0_31 = arith.constant 0 : index
    %29 = vector.load %arg1[%c0_28, %c1_29, %c1_30, %c0_31] : memref<1x10x18x128xbf16, #tpu.memory_space<vmem>>, vector<1x8x16x128xbf16>
    %30 = vector.shape_cast %29 : vector<1x8x16x128xbf16> to vector<8x16x128xbf16>
    %31 = vector.shape_cast %30 : vector<8x16x128xbf16> to vector<128x128xbf16>
    %c4 = arith.constant 4 : index
    %c0_32 = arith.constant 0 : index
    %c0_33 = arith.constant 0 : index
    %32 = vector.load %arg2[%c4, %c0_32, %c0_33] : memref<9x128x128xbf16, #tpu.memory_space<vmem>>, vector<1x128x128xbf16>
    %33 = vector.shape_cast %32 : vector<1x128x128xbf16> to vector<128x128xbf16>
    %cst_34 = arith.constant dense<0.000000e+00> : vector<128x128xf32>
    %34 = tpu.matmul %31, %33, %cst_34 {dimension_numbers = #tpu.dot_dimension_numbers<[1], [0], [0], [1], [0, 0, 1, 1], [], []>} : vector<128x128xbf16>, vector<128x128xbf16>, vector<128x128xf32> -> vector<128x128xf32>
    %35 = arith.addf %28, %34 : vector<128x128xf32>
    %c0_35 = arith.constant 0 : index
    %c1_36 = arith.constant 1 : index
    %c2_37 = arith.constant 2 : index
    %c0_38 = arith.constant 0 : index
    %36 = vector.load %arg1[%c0_35, %c1_36, %c2_37, %c0_38] : memref<1x10x18x128xbf16, #tpu.memory_space<vmem>>, vector<1x8x16x128xbf16>
    %37 = vector.shape_cast %36 : vector<1x8x16x128xbf16> to vector<8x16x128xbf16>
    %38 = vector.shape_cast %37 : vector<8x16x128xbf16> to vector<128x128xbf16>
    %c5 = arith.constant 5 : index
    %c0_39 = arith.constant 0 : index
    %c0_40 = arith.constant 0 : index
    %39 = vector.load %arg2[%c5, %c0_39, %c0_40] : memref<9x128x128xbf16, #tpu.memory_space<vmem>>, vector<1x128x128xbf16>
    %40 = vector.shape_cast %39 : vector<1x128x128xbf16> to vector<128x128xbf16>
    %cst_41 = arith.constant dense<0.000000e+00> : vector<128x128xf32>
    %41 = tpu.matmul %38, %40, %cst_41 {dimension_numbers = #tpu.dot_dimension_numbers<[1], [0], [0], [1], [0, 0, 1, 1], [], []>} : vector<128x128xbf16>, vector<128x128xbf16>, vector<128x128xf32> -> vector<128x128xf32>
    %42 = arith.addf %35, %41 : vector<128x128xf32>
    %c0_42 = arith.constant 0 : index
    %c2_43 = arith.constant 2 : index
    %c0_44 = arith.constant 0 : index
    %c0_45 = arith.constant 0 : index
    %43 = vector.load %arg1[%c0_42, %c2_43, %c0_44, %c0_45] : memref<1x10x18x128xbf16, #tpu.memory_space<vmem>>, vector<1x8x16x128xbf16>
    %44 = vector.shape_cast %43 : vector<1x8x16x128xbf16> to vector<8x16x128xbf16>
    %45 = vector.shape_cast %44 : vector<8x16x128xbf16> to vector<128x128xbf16>
    %c6 = arith.constant 6 : index
    %c0_46 = arith.constant 0 : index
    %c0_47 = arith.constant 0 : index
    %46 = vector.load %arg2[%c6, %c0_46, %c0_47] : memref<9x128x128xbf16, #tpu.memory_space<vmem>>, vector<1x128x128xbf16>
    %47 = vector.shape_cast %46 : vector<1x128x128xbf16> to vector<128x128xbf16>
    %cst_48 = arith.constant dense<0.000000e+00> : vector<128x128xf32>
    %48 = tpu.matmul %45, %47, %cst_48 {dimension_numbers = #tpu.dot_dimension_numbers<[1], [0], [0], [1], [0, 0, 1, 1], [], []>} : vector<128x128xbf16>, vector<128x128xbf16>, vector<128x128xf32> -> vector<128x128xf32>
    %49 = arith.addf %42, %48 : vector<128x128xf32>
    %c0_49 = arith.constant 0 : index
    %c2_50 = arith.constant 2 : index
    %c1_51 = arith.constant 1 : index
    %c0_52 = arith.constant 0 : index
    %50 = vector.load %arg1[%c0_49, %c2_50, %c1_51, %c0_52] : memref<1x10x18x128xbf16, #tpu.memory_space<vmem>>, vector<1x8x16x128xbf16>
    %51 = vector.shape_cast %50 : vector<1x8x16x128xbf16> to vector<8x16x128xbf16>
    %52 = vector.shape_cast %51 : vector<8x16x128xbf16> to vector<128x128xbf16>
    %c7 = arith.constant 7 : index
    %c0_53 = arith.constant 0 : index
    %c0_54 = arith.constant 0 : index
    %53 = vector.load %arg2[%c7, %c0_53, %c0_54] : memref<9x128x128xbf16, #tpu.memory_space<vmem>>, vector<1x128x128xbf16>
    %54 = vector.shape_cast %53 : vector<1x128x128xbf16> to vector<128x128xbf16>
    %cst_55 = arith.constant dense<0.000000e+00> : vector<128x128xf32>
    %55 = tpu.matmul %52, %54, %cst_55 {dimension_numbers = #tpu.dot_dimension_numbers<[1], [0], [0], [1], [0, 0, 1, 1], [], []>} : vector<128x128xbf16>, vector<128x128xbf16>, vector<128x128xf32> -> vector<128x128xf32>
    %56 = arith.addf %49, %55 : vector<128x128xf32>
    %c0_56 = arith.constant 0 : index
    %c2_57 = arith.constant 2 : index
    %c2_58 = arith.constant 2 : index
    %c0_59 = arith.constant 0 : index
    %57 = vector.load %arg1[%c0_56, %c2_57, %c2_58, %c0_59] : memref<1x10x18x128xbf16, #tpu.memory_space<vmem>>, vector<1x8x16x128xbf16>
    %58 = vector.shape_cast %57 : vector<1x8x16x128xbf16> to vector<8x16x128xbf16>
    %59 = vector.shape_cast %58 : vector<8x16x128xbf16> to vector<128x128xbf16>
    %c8 = arith.constant 8 : index
    %c0_60 = arith.constant 0 : index
    %c0_61 = arith.constant 0 : index
    %60 = vector.load %arg2[%c8, %c0_60, %c0_61] : memref<9x128x128xbf16, #tpu.memory_space<vmem>>, vector<1x128x128xbf16>
    %61 = vector.shape_cast %60 : vector<1x128x128xbf16> to vector<128x128xbf16>
    %cst_62 = arith.constant dense<0.000000e+00> : vector<128x128xf32>
    %62 = tpu.matmul %59, %61, %cst_62 {dimension_numbers = #tpu.dot_dimension_numbers<[1], [0], [0], [1], [0, 0, 1, 1], [], []>} : vector<128x128xbf16>, vector<128x128xbf16>, vector<128x128xf32> -> vector<128x128xf32>
    %63 = arith.addf %56, %62 : vector<128x128xf32>
    %64 = arith.truncf %63 : vector<128x128xf32> to vector<128x128xbf16>
    %c0_63 = arith.constant 0 : index
    %c0_64 = arith.constant 0 : index
    %c0_65 = arith.constant 0 : index
    %65 = vector.load %arg3[%c0_63, %c0_64, %c0_65] : memref<1x128x128xbf16, #tpu.memory_space<vmem>>, vector<1x128x128xbf16>
    %66 = vector.shape_cast %65 : vector<1x128x128xbf16> to vector<128x128xbf16>
    %67 = vector.shape_cast %64 : vector<128x128xbf16> to vector<1x128x128xbf16>
    tpu.vector_store %arg3[%c0_63, %c0_64, %c0_65], %67 {strides = array<i32>} : memref<1x128x128xbf16, #tpu.memory_space<vmem>>, vector<1x128x128xbf16>,
    %cst_66 = arith.constant dense<0.000000e+00> : vector<128xf32>
    %68 = vector.multi_reduction <add>, %63, %cst_66 [0] : vector<128x128xf32> to vector<128xf32>
    %69 = vector.shape_cast %68 : vector<128xf32> to vector<1x128xf32>
    %70 = arith.mulf %63, %63 : vector<128x128xf32>
    %cst_67 = arith.constant dense<0.000000e+00> : vector<128xf32>
    %71 = vector.multi_reduction <add>, %70, %cst_67 [0] : vector<128x128xf32> to vector<128xf32>
    %72 = vector.shape_cast %71 : vector<128xf32> to vector<1x128xf32>
    %73 = tpu.concatenate %69, %72 in 0 : vector<1x128xf32>, vector<1x128xf32> -> vector<2x128xf32>
    %c0_68 = arith.constant 0 : index
    %c0_69 = arith.constant 0 : index
    %c0_70 = arith.constant 0 : index
    %74 = vector.load %arg4[%c0_68, %c0_69, %c0_70] : memref<1x2x128xf32, #tpu.memory_space<vmem>>, vector<1x2x128xf32>
    %75 = vector.shape_cast %74 : vector<1x2x128xf32> to vector<2x128xf32>
    %76 = vector.shape_cast %73 : vector<2x128xf32> to vector<1x2x128xf32>
    tpu.vector_store %arg4[%c0_68, %c0_69, %c0_70], %76 {strides = array<i32>} : memref<1x2x128xf32, #tpu.memory_space<vmem>>, vector<1x2x128xf32>,
    return
  }
  func.func @transform_0(%arg0: i32) -> (i32, i32, i32, i32) {
    %c0_i32 = arith.constant 0 : i32
    %c0_i32_0 = arith.constant 0 : i32
    %c0_i32_1 = arith.constant 0 : i32
    %c0_i32_2 = arith.constant 0 : i32
    return %arg0, %c0_i32, %c0_i32_0, %c0_i32_1 : i32, i32, i32, i32
  }
  func.func @transform_1(%arg0: i32) -> (i32, i32, i32) {
    %c0_i32 = arith.constant 0 : i32
    %c0_i32_0 = arith.constant 0 : i32
    %c0_i32_1 = arith.constant 0 : i32
    %c0_i32_2 = arith.constant 0 : i32
    return %c0_i32, %c0_i32_0, %c0_i32_1 : i32, i32, i32
  }
  func.func @transform_2(%arg0: i32) -> (i32, i32, i32) {
    %c0_i32 = arith.constant 0 : i32
    %c0_i32_0 = arith.constant 0 : i32
    %c0_i32_1 = arith.constant 0 : i32
    return %arg0, %c0_i32, %c0_i32_0 : i32, i32, i32
  }
  func.func @transform_3(%arg0: i32) -> (i32, i32, i32) {
    %c0_i32 = arith.constant 0 : i32
    %c0_i32_0 = arith.constant 0 : i32
    %c0_i32_1 = arith.constant 0 : i32
    return %arg0, %c0_i32, %c0_i32_0 : i32, i32, i32
  }
}

</mosaic_0001>

<bundles_post_ra>
// kernel: tpu_custom_call.1
= control target key start
LH: loop header
LB: loop body
LE: loop exit
PB: predicated region body
PF: predicated region fallthrough
CT: control target
= control target key end

     0   :  { %9 = vsyncpa [#allocation3], 0  ;;  %s5820_s0 = inlined_call_operand.vmem [shape: bf16[4,10,18,128], index: 0, kind: input, shape index: {}]   ;;  %s5821_s1 = inlined_call_operand.vmem [shape: bf16[9,128,128], index: 1, kind: input, shape index: {}]   ;;  %s5822_s2 = inlined_call_operand.hbm [shape: bf16[4,128,128], index: 2, kind: output, shape index: {0}]   ;;  %s5823_s3 = inlined_call_operand.hbm [shape: f32[4,2,128], index: 3, kind: output, shape index: {1}]  }
   0x1   :  { %11 = vsyncpa [#allocation3 + $0x1], 0 }
   0x2   :  { %12 = vsyncpa [#allocation5], 0 }
   0x3   :  { %14 = vsyncpa [#allocation5 + $0x1], 0  ;;  %s4626_s12 = smov 0   ;;  %s4628_s13 = smov 0  }
   0x4   :  { %s4630_s14 = smov 0   ;;  %s4632_s15 = smov 0  }
   0x5 LB: > { %s4647_s16 = sadd.s32 4294967295, %s4600_s15   ;;  %s3297_s17 = sadd.s32 4294967294, %s4600_s15   ;;  %s4600_s15 = sphi %s4632_s15, %s5842_s15   ;;  %s4596_s14 = sphi %s4630_s14, %s5841_s14   ;;  %s4592_s13 = sphi %s4628_s13, %s5840_s13   ;;  %s4588_s12 = sphi %s4626_s12, %s5839_s12  }
   0x6   : > { %s4651_s18 = sadd.s32 1, %s4600_s15   ;;  %s74_s19 = sadd.s32 1, %s4596_s14 }
   0x7   : > { %s71_s20 = ssub.s32 %s4600_s15, %s4651_s18  ;;  %p84_p0 = scmp.ne.s32.totalorder %s4596_s14, %s4592_s13 }
   0x8   : > { %p72_p1 = scmp.eq.s32.totalorder %s71_s20, 0  ;;  %p85_p2 = scmp.eq.s32.totalorder %s4647_s16, 3 }
   0x9   : > { %p90_p3 = scmp.ne.s32.totalorder %s4592_s13, %s4588_s12  ;;  %p91_p4 = scmp.eq.s32.totalorder %s3297_s17, 3 }
   0xa   : > { %s4662_s21 = scalar_select %p72_p1, %s4596_s14, %s74_s19  }
   0xb   : > { %p4664_p5 = por %p85_p2, %p84_p0  ;;  %p4668_p6 = por %p91_p4, %p90_p3 }
   0xc   : > { %p3300_p7 = scmp.ge.s32.totalorder %s4600_s15, 1  ;;  %p146_p8 = scmp.lt.s32.totalorder %s4600_s15, 5 }
   0xe   : > { %p147_p9 = pnand %p3300_p7, %p146_p8 }
  0x10   : > { %150 = sbr.rel (%p147_p9) target bundleno = 499 (0x1f3), region = 28 }
  0x17   : > { %v4406_v0 = vld [vmem:[%s5821_s1 + $0x40] sm:$0xff]   ;;  %p175_p10 = scmp.lt.s32.totalorder %s4647_s16, 3  ;;  %v4408_v2 = vld [vmem:[%s5821_s1 + $0x48] sm:$0xff]   ;;  %v4410_v4 = vld [vmem:[%s5821_s1 + $0x50] sm:$0xff]   ;;  %vm221_vm0 = vsmask.f32 3328 }
  0x18   : > { %v4407_v1 = vld [vmem:[%s5821_s1 + $0x100] sm:$0xff]   ;;  %3927 = vmatprep.subr.bf16.mxu1 %v4406_v0  ;;  %v4409_v3 = vld [vmem:[%s5821_s1 + $0x108] sm:$0xff]   ;;  %v4411_v5 = vld [vmem:[%s5821_s1 + $0x110] sm:$0xff]   ;;  %vm222_vm1 = vsmask.f32 7440  ;;  %vm827_vm3 = vcmask 1042432  }
  0x19   : > { %4055 = vmatprep.subr.bf16.mxu0 %v4407_v1  ;;  %3928 = vmatpush3.bf16.msra.mxu1 %v4406_v0  ;;  %s176_s9 = scalar_select %p175_p10, %s4647_s16, 3  ;;  %v4412_v6 = vld [vmem:[%s5821_s1 + $0x58] sm:$0xff]   ;;  %v4414_v8 = vld [vmem:[%s5821_s1 + $0x60] sm:$0xff]   ;;  %v4416_v10 = vld [vmem:[%s5821_s1 + $0x68] sm:$0xff]   ;;  %vm828_vm4 = vcmask 1046532  }
  0x1a   : > { %4056 = vmatpush3.bf16.msra.mxu0 %v4407_v1  ;;  %3929 = vmatprep.subr.bf16.mxu1 %v4408_v2  ;;  %v4413_v7 = vld [vmem:[%s5821_s1 + $0x118] sm:$0xff]   ;;  %v4415_v9 = vld [vmem:[%s5821_s1 + $0x120] sm:$0xff]   ;;  %v4417_v11 = vld [vmem:[%s5821_s1 + $0x128] sm:$0xff]   ;;  %s3735_s11 = sshll.u32 %s4647_s16, 10  ;;  %s4602_s27 = smov [#allocation2]  }
  0x1b   : > { %4057 = vmatprep.subr.bf16.mxu0 %v4409_v3  ;;  %s4359_s20 = smul.u32 120, %s176_s9  ;;  %v4418_v25 = vld [vmem:[%s5821_s1 + $0x70] sm:$0xff]   ;;  %v4420_v35 = vld [vmem:[%s5821_s1 + $0x78] sm:$0xff]   ;;  %vm4754_vm2 = vmor %vm221_vm0, %vm222_vm1  ;;  %s5718_s24 = scalar_lea.hbm %s5822_s2, %s3735_s11 }
  0x1c   : > { %v4419_v29 = vld [vmem:[%s5821_s1 + $0x130] sm:$0xff]   ;;  %v4421_v50 = vld [vmem:[%s5821_s1 + $0x138] sm:$0xff]   ;;  %vm5051_vm5 = vmor %vm827_vm3, %vm828_vm4  ;;  %s4510_s28 = sshll.u32 %s4602_s27, 4  ;;  %s4511_s28 = int_to_ptr.vmem [resolvable:$false] %s4510_s28 }
  0x1d   : > { %3930 = vmatpush3.bf16.msra.mxu1 %v4408_v2  ;;  %s4709_s30 = scalar_lea.vmem %s5820_s0, %s4359_s20  ;;  %v4422_v2 = vld [vmem:[%s5821_s1] sm:$0xff]   ;;  %s4512_s29 = scalar_lea.vmem %s4511_s28, 2048 }
  0x1e   : > { %4058 = vmatpush3.bf16.msra.mxu0 %v4409_v3  ;;  %3931 = vmatprep.subr.bf16.mxu1 %v4410_v4  ;;  %v4718_v12 = vld [vmem:[%s4709_s30] sm:$0xf]  ;;  %v4721_v13 = vld [vmem:[%s4709_s30 + $0x4] sm:$0xf]  ;;  %v4724_v14 = vld [vmem:[%s4709_s30 + $0x8] sm:$0x1] }
  0x1f   : > { %4059 = vmatprep.subr.bf16.mxu0 %v4411_v5  ;;  %v225_v15 = vshrl.u32 %v4718_v12, 16  ;;  %v228_v16 = vshll.u32 %v4718_v12, 16  ;;  %v234_v17 = vshll.u32 %v4721_v13, 16  ;;  %v238_v18 = vshrl.u32 %v4721_v13, 16  ;;  %v3440_v20 = vld [vmem:[%s4709_s30 + $0xc] sm:$0xf] }
  0x20   : > { %v244_v19 = vshll.u32 %v4724_v14, 16  ;;  %v4733_v23 = vld [vmem:[%s4709_s30 + $0x10] sm:$0xf]  ;;  %v4736_v24 = vld [vmem:[%s4709_s30 + $0x14] sm:$0x1]  ;;  %v1364_v28 = vshrl.u32 %v3440_v20, 16 }
  0x21   : > { %3932 = vmatpush3.bf16.msra.mxu1 %v4410_v4  ;;  %v227_v21 = vrot.slane %v225_v15, 4  ;;  %v230_v22 = vrot.slane %v228_v16, 5  ;;  %v236_v26 = vrot.slane %v234_v17, 5  ;;  %v240_v27 = vrot.slane %v238_v18, 4  ;;  %v4747_v34 = vld [vmem:[%s4709_s30 + $0xc] sm:$0xf] }
  0x22   : > { %4060 = vmatpush3.bf16.msra.mxu0 %v4411_v5  ;;  %3933 = vmatprep.subr.bf16.mxu1 %v4412_v6  ;;  %v1367_v31 = vshll.u32 %v3440_v20, 16  ;;  %v1373_v32 = vshll.u32 %v4733_v23, 16  ;;  %v1377_v33 = vshrl.u32 %v4733_v23, 16  ;;  %v246_v38 = vrot.slane %v244_v19, 5  ;;  %v4760_v41 = vld [vmem:[%s4709_s30 + $0x10] sm:$0xf] }
  0x23   : > { %4061 = vmatprep.subr.bf16.mxu0 %v4413_v7  ;;  %v231_v30 = vor.u32 %v230_v22, %v227_v21  ;;  %v241_v37 = vor.u32 %v240_v27, %v236_v26  ;;  %v1366_v39 = vrot.slane %v1364_v28, 4  ;;  %v1383_v40 = vshll.u32 %v4736_v24, 16  ;;  %v4770_v54 = vld [vmem:[%s4709_s30 + $0x14] sm:$0x1]  ;;  %v3443_v56 = vld [vmem:[%s4709_s30 + $0x18] sm:$0xf] }
  0x24   : > { %v1369_v43 = vrot.slane %v1367_v31, 5  ;;  %v1375_v44 = vrot.slane %v1373_v32, 5  ;;  %v1379_v45 = vrot.slane %v1377_v33, 4  ;;  %v249_v48 = vshrl.u32 %v4747_v34, 16  ;;  %v4778_v61 = vld [vmem:[%s4709_s30 + $0x1c] sm:$0xf] }
  0x25   : > { %3934 = vmatpush3.bf16.msra.mxu1 %v4412_v6  ;;  %v232_v42 = vrot.slane %v231_v30, 4  ;;  %v242_v46 = vrot.slane %v241_v37, 4  ;;  %v1385_v47 = vrot.slane %v1383_v40, 5  ;;  %v252_v49 = vshll.u32 %v4747_v34, 16  ;;  %v4786_v3 = vld [vmem:[%s5821_s1 + $0x140] sm:$0xff]  }
  0x26   : > { %4062 = vmatpush3.bf16.msra.mxu0 %v4413_v7  ;;  %3935 = vmatprep.subr.bf16.mxu1 %v4414_v8  ;;  %v1370_v52 = vor.u32 %v1369_v43, %v1366_v39  ;;  %v1380_v53 = vor.u32 %v1379_v45, %v1375_v44  ;;  %v258_v55 = vshll.u32 %v4760_v41, 16  ;;  %v251_v58 = vrot.slane %v249_v48, 4  ;;  %v4790_v7 = vld [vmem:[%s4709_s30 + $0x20] sm:$0x1]  ;;  %v4807_v33 = vld [vmem:[%s4709_s30 + $0x1c] sm:$0xf] }
  0x27   : > { %4063 = vmatprep.subr.bf16.mxu0 %v4415_v9  ;;  %v237_v51 = vsel %vm4754_vm2, %v232_v42, %v236_v26  ;;  %v247_v57 = vsel %vm4754_vm2, %v242_v46, %v246_v38  ;;  %v254_v59 = vrot.slane %v252_v49, 5  ;;  %v262_v60 = vshrl.u32 %v4760_v41, 16  ;;  %v3446_v42 = vld [vmem:[%s4709_s30 + $0x24] sm:$0xf]  ;;  %v4424_v46 = vld [vmem:[%s5821_s1 + $0x8] sm:$0xff]  }
  0x28   : > { %v3320_v62 = vcombine.low %v237_v51, %v247_v57  ;;  %v1371_v63 = vrot.slane %v1370_v52, 4  ;;  %v1381_v0 = vrot.slane %v1380_v53, 4  ;;  %v260_v1 = vrot.slane %v258_v55, 5  ;;  %v4822_v52 = vld [vmem:[%s4709_s30 + $0x28] sm:$0xf] }
  0x29   : > { %3936 = vmatpush3.bf16.msra.mxu1 %v4414_v8  ;;  %v255_v4 = vor.u32 %v254_v59, %v251_v58  ;;  %v264_v5 = vrot.slane %v262_v60, 4  ;;  %v268_v6 = vshll.u32 %v4770_v54, 16  ;;  %v1397_v21 = vshll.u32 %v4778_v61, 16  ;;  %v4827_v57 = vld [vmem:[%s4709_s30 + $0x2c] sm:$0x1]  ;;  %v4426_v59 = vld [vmem:[%s5821_s1 + $0x10] sm:$0xff]  }
  0x2a   : > { %4064 = vmatpush3.bf16.msra.mxu0 %v4415_v9  ;;  %3937 = vmatprep.subr.bf16.mxu1 %v4416_v10  ;;  %v1376_v8 = vsel %vm4754_vm2, %v1371_v63, %v1375_v44  ;;  %v1386_v9 = vsel %vm4754_vm2, %v1381_v0, %v1385_v47  ;;  %v1401_v22 = vshrl.u32 %v4778_v61, 16  ;;  %v282_v49 = vshll.u32 %v4807_v33, 16  ;;  %v4425_v60 = vld [vmem:[%s5821_s1 + $0x148] sm:$0xff]  }
  0x2b   : > { %4065 = vmatprep.subr.bf16.mxu0 %v4417_v11  ;;  %3943 = vmatprep.mubr.bf16.mxu1 %v3320_v62  ;;  %v3480_v15 = vcombine.low %v1376_v8, %v1386_v9  ;;  %v256_v16 = vrot.slane %v255_v4, 4  ;;  %v265_v17 = vor.u32 %v264_v5, %v260_v1  ;;  %v270_v18 = vrot.slane %v268_v6, 5  ;;  %v4836_v4 = vld [vmem:[%s4709_s30 + $0x24] sm:$0xf] }
  0x2c   : > { %v1399_v31 = vrot.slane %v1397_v21, 5  ;;  %v1403_v32 = vrot.slane %v1401_v22, 4  ;;  %v1412_v58 = vshrl.u32 %v3446_v42, 16  ;;  %v284_v62 = vrot.slane %v282_v49, 5  ;;  %v3449_v22 = vld [vmem:[%s4709_s30 + $0x30] sm:$0xf] }
  0x2d   : > { %3938 = vmatpush3.bf16.msra.mxu1 %v4416_v10  ;;  %v1388_v10 = vshrl.u32 %v3443_v56, 16  ;;  %4071 = vmatprep.mubr.bf16.mxu0 %v3480_v15  ;;  %v261_v27 = vsel %vm4754_vm2, %v256_v16, %v260_v1  ;;  %v266_v28 = vrot.slane %v265_v17, 4  ;;  %v1415_v1 = vshll.u32 %v3446_v42, 16  ;;  %v4843_v16 = vld [vmem:[%s4709_s30 + $0x28] sm:$0xf]  ;;  %v4428_v42 = vld [vmem:[%s5821_s1 + $0x18] sm:$0xff]  }
  0x2e   : > { %4066 = vmatpush3.bf16.msra.mxu0 %v4417_v11  ;;  %3939 = vmatprep.subr.bf16.mxu1 %v4418_v25  ;;  %v1391_v11 = vshll.u32 %v3443_v56, 16  ;;  %v1404_v45 = vor.u32 %v1403_v32, %v1399_v31  ;;  %v1414_v8 = vrot.slane %v1412_v58, 4  ;;  %v1425_v15 = vshrl.u32 %v4822_v52, 16  ;;  %v4846_v17 = vld [vmem:[%s4709_s30 + $0x2c] sm:$0x1]  ;;  %v4427_v32 = vld [vmem:[%s5821_s1 + $0x150] sm:$0xff]  }
  0x2f   : > { %4067 = vmatprep.subr.bf16.mxu0 %v4419_v29  ;;  %v1390_v19 = vrot.slane %v1388_v10, 4  ;;  %v271_v37 = vsel %vm4754_vm2, %v266_v28, %v270_v18  ;;  %v297_v21 = vshrl.u32 %v4836_v4, 16  ;;  %v316_v49 = vshll.u32 %v4846_v17, 16  ;;  %v4429_v58 = vld [vmem:[%s5821_s1 + $0x158] sm:$0xff]  }
  0x30   : > { %v1393_v20 = vrot.slane %v1391_v11, 5  ;;  %v3321_v43 = vcombine.low %v261_v27, %v271_v37  ;;  %v1405_v55 = vrot.slane %v1404_v45, 4  ;;  %v1417_v11 = vrot.slane %v1415_v1, 5 }
  0x31   : > { %3940 = vmatpush3.bf16.msra.mxu1 %v4418_v25  ;;  %v4799_v25 = vld [vmem:[%s4709_s30 + $0x18] sm:$0xf] }
  0x32   : > { %4068 = vmatpush3.bf16.msra.mxu0 %v4419_v29  ;;  %3941 = vmatprep.subr.bf16.mxu1 %v4420_v35  ;;  %v1407_v29 = vshll.u32 %v4790_v7, 16  ;;  %v1394_v30 = vor.u32 %v1393_v20, %v1390_v19  ;;  %v273_v40 = vshrl.u32 %v4799_v25, 16  ;;  %v276_v47 = vshll.u32 %v4799_v25, 16 }
  0x33   : > { %4069 = vmatprep.subr.bf16.mxu0 %v4421_v50  ;;  %v1431_v20 = vshll.u32 %v4827_v57, 16  ;;  %v1418_v28 = vor.u32 %v1417_v11, %v1414_v8 }
  0x34   : > { %v1409_v38 = vrot.slane %v1407_v29, 5  ;;  %v1395_v44 = vrot.slane %v1394_v30, 4  ;;  %v275_v48 = vrot.slane %v273_v40, 4  ;;  %v278_v56 = vrot.slane %v276_v47, 5 }
  0x35   : > { %3942 = vmatpush3.bf16.msra.mxu1 %v4420_v35  ;;  %v215_v35 = vld [vmem:[%s4709_s30 + $0x20] sm:$0x1]  ;;  %v1427_v29 = vrot.slane %v1425_v15, 4  ;;  %v300_v30 = vshll.u32 %v4836_v4, 16  ;;  %v1433_v37 = vrot.slane %v1431_v20, 5  ;;  %v306_v40 = vshll.u32 %v4843_v16, 16 }
  0x36   : > { %4070 = vmatpush3.bf16.msra.mxu0 %v4421_v50  ;;  %3959 = vmatprep.subr.bf16.mxu1 %v4422_v2  ;;  %v286_v50 = vshrl.u32 %v4807_v33, 16  ;;  %v292_v51 = vshll.u32 %v215_v35, 16  ;;  %v1400_v53 = vsel %vm4754_vm2, %v1395_v44, %v1399_v31  ;;  %v1410_v5 = vsel %vm4754_vm2, %v1405_v55, %v1409_v38  ;;  %v4853_v31 = vld [vmem:[%s4709_s30 + $0x34] sm:$0xf]  ;;  %v4872_v55 = vld [vmem:[%s4709_s30 + $0x38] sm:$0x1] }
  0x37   : > { %4087 = vmatprep.subr.bf16.mxu0 %v4786_v3  ;;  %v279_v6 = vor.u32 %v278_v56, %v275_v48  ;;  %v3481_v9 = vcombine.low %v1400_v53, %v1410_v5  ;;  %v299_v38 = vrot.slane %v297_v21, 4  ;;  %v1419_v44 = vrot.slane %v1418_v28, 4  ;;  %v4879_v5 = vld [vmem:[%s4709_s30 + $0x30] sm:$0xf] }
  0x38   : > { %3944 = vmatmul.mubr.bf16.vlgmr.msra.gmra.mrb[0].mxu1 %v3321_v43  ;;  %v288_v63 = vrot.slane %v286_v50, 4  ;;  %v294_v0 = vrot.slane %v292_v51, 5  ;;  %v308_v47 = vrot.slane %v306_v40, 5  ;;  %v310_v48 = vshrl.u32 %v4843_v16, 16 }
  0x39   : > { %3960 = vmatpush3.bf16.msra.mxu1 %v4422_v2  ;;  %v1421_v2 = vshll.u32 %v4822_v52, 16  ;;  %v280_v18 = vrot.slane %v279_v6, 4  ;;  %4072 = vmatmul.mubr.bf16.vlgmr.msra.gmra.mrb[0].mxu0 %v3481_v9  ;;  %v1436_v56 = vshrl.u32 %v3449_v22, 16  ;;  %v1445_v1 = vshll.u32 %v4853_v31, 16  ;;  %v4885_v9 = vld [vmem:[%s4709_s30 + $0x34] sm:$0xf] }
  0x3a   : > { %3961 = vmatprep.subr.bf16.mxu1 %v4424_v46  ;;  %v289_v10 = vor.u32 %v288_v63, %v284_v62  ;;  %4088 = vmatpush3.bf16.msra.mxu0 %v4786_v3  ;;  %v302_v3 = vrot.slane %v300_v30, 5  ;;  %v318_v63 = vrot.slane %v316_v49, 5  ;;  %v1455_v21 = vshll.u32 %v4872_v55, 16 }
  0x3b   : > { %v1423_v19 = vrot.slane %v1421_v2, 5  ;;  %v285_v35 = vsel %vm4754_vm2, %v280_v18, %v284_v62  ;;  %4089 = vmatprep.subr.bf16.mxu0 %v4425_v60  ;;  %v312_v62 = vrot.slane %v310_v48, 4  ;;  %v1438_v2 = vrot.slane %v1436_v56, 4  ;;  %v4910_v48 = vld [vmem:[%s4709_s30 + $0x40] sm:$0xf]  ;;  %v4434_v56 = vld [vmem:[%s5821_s1 + $0x30] sm:$0xff]  }
  0x3c   : > { %v290_v27 = vrot.slane %v289_v10, 4  ;;  %v303_v53 = vor.u32 %v302_v3, %v299_v38  ;;  %v1447_v18 = vrot.slane %v1445_v1, 5  ;;  %v324_v30 = vshll.u32 %v4879_v5, 16 }
  0x3d   : > { %3962 = vmatpush3.bf16.msra.mxu1 %v4424_v46  ;;  %v1428_v45 = vor.u32 %v1427_v29, %v1423_v19  ;;  %v1424_v50 = vsel %vm4754_vm2, %v1419_v44, %v1423_v19  ;;  %v313_v11 = vor.u32 %v312_v62, %v308_v47  ;;  %v4895_v29 = vld [vmem:[%s4709_s30 + $0x38] sm:$0x1]  ;;  %v1457_v40 = vrot.slane %v1455_v21, 5  ;;  %v3452_v44 = vld [vmem:[%s4709_s30 + $0x3c] sm:$0xf] }
  0x3e   : > { %3963 = vmatprep.subr.bf16.mxu1 %v4426_v59  ;;  %v295_v43 = vsel %vm4754_vm2, %v290_v27, %v294_v0  ;;  %4090 = vmatpush3.bf16.msra.mxu0 %v4425_v60  ;;  %v1439_v0 = vshll.u32 %v3449_v22, 16  ;;  %v304_v8 = vrot.slane %v303_v53, 4  ;;  %v4430_v60 = vld [vmem:[%s5821_s1 + $0x20] sm:$0xff]   ;;  %v321_v22 = vshrl.u32 %v4879_v5, 16 }
  0x3f   : > { %v3322_v46 = vcombine.low %v285_v35, %v295_v43  ;;  %v1429_v51 = vrot.slane %v1428_v45, 4  ;;  %4091 = vmatprep.subr.bf16.mxu0 %v4427_v32  ;;  %v314_v27 = vrot.slane %v313_v11, 4  ;;  %v330_v35 = vshll.u32 %v4885_v9, 16  ;;  %v4931_v11 = vld [vmem:[%s4709_s30 + $0x40] sm:$0xf] }
  0x40   : > { %v1441_v15 = vrot.slane %v1439_v0, 5  ;;  %v309_v19 = vsel %vm4754_vm2, %v304_v8, %v308_v47  ;;  %v334_v43 = vshrl.u32 %v4885_v9, 16  ;;  %v340_v53 = vshll.u32 %v4895_v29, 16  ;;  %v4919_v0 = vld [vmem:[%s4709_s30 + $0x44] sm:$0x1]  ;;  %v4433_v8 = vld [vmem:[%s5821_s1 + $0x168] sm:$0xff]  }
  0x41   : > { %3964 = vmatpush3.bf16.msra.mxu1 %v4426_v59  ;;  %3947 = vmatprep.mubr.bf16.mxu1 %v3322_v46  ;;  %v1434_v6 = vsel %vm4754_vm2, %v1429_v51, %v1433_v37  ;;  %v1449_v59 = vshrl.u32 %v4853_v31, 16  ;;  %v4432_v37 = vld [vmem:[%s5821_s1 + $0x28] sm:$0xff]   ;;  %v319_v45 = vsel %vm4754_vm2, %v314_v27, %v318_v63  ;;  %v326_v46 = vrot.slane %v324_v30, 5  ;;  %v4934_v21 = vld [vmem:[%s4709_s30 + $0x44] sm:$0x1] }
  0x42   : > { %3965 = vmatprep.subr.bf16.mxu1 %v4428_v42  ;;  %v3482_v10 = vcombine.low %v1424_v50, %v1434_v6  ;;  %v1442_v28 = vor.u32 %v1441_v15, %v1438_v2  ;;  %4092 = vmatpush3.bf16.msra.mxu0 %v4427_v32  ;;  %v4431_v32 = vld [vmem:[%s5821_s1 + $0x160] sm:$0xff]   ;;  %v332_v47 = vrot.slane %v330_v35, 5  ;;  %v3323_v49 = vcombine.low %v309_v19, %v319_v45  ;;  %v4947_v45 = vld [vmem:[%s4709_s30 + $0x4c] sm:$0xf] }
  0x43   : > { %v1451_v20 = vrot.slane %v1449_v59, 4  ;;  %4093 = vmatprep.subr.bf16.mxu0 %v4429_v58  ;;  %v336_v51 = vrot.slane %v334_v43, 4  ;;  %v1460_v1 = vshrl.u32 %v3452_v44, 16  ;;  %v1463_v6 = vshll.u32 %v3452_v44, 16  ;;  %5830 = vst [vmem:[#allocation8_spill] sm:$0xff] %v4934_v21 }
  0x44   : > { %4075 = vmatprep.mubr.bf16.mxu0 %v3482_v10  ;;  %v1443_v3 = vrot.slane %v1442_v28, 4  ;;  %3948 = vmatmul.mubr.bf16.gmra.mrb[4].mxu1 %v3323_v49  ;;  %v4928_v10 = vld [vmem:[%s4709_s30 + $0x3c] sm:$0xf]  ;;  %v1473_v30 = vshrl.u32 %v4910_v48, 16  ;;  %v1479_v35 = vshll.u32 %v4919_v0, 16 }
  0x45   : > { %3966 = vmatpush3.bf16.msra.mxu1 %v4428_v42  ;;  %v1452_v38 = vor.u32 %v1451_v20, %v1447_v18  ;;  %v323_v42 = vrot.slane %v321_v22, 4  ;;  %v337_v59 = vor.u32 %v336_v51, %v332_v47  ;;  %v1462_v19 = vrot.slane %v1460_v1, 4  ;;  %v4436_v22 = vld [vmem:[%s5821_s1 + $0x38] sm:$0xff]  }
  0x46   : > { %3967 = vmatprep.subr.bf16.mxu1 %v4430_v60  ;;  %v1448_v62 = vsel %vm4754_vm2, %v1443_v3, %v1447_v18  ;;  %4094 = vmatpush3.bf16.msra.mxu0 %v4429_v58  ;;  %v1469_v58 = vshll.u32 %v4910_v48, 16  ;;  %v1465_v20 = vrot.slane %v1463_v6, 5  ;;  %v345_v43 = vshrl.u32 %v4928_v10, 16 }
  0x47   : > { %v1453_v50 = vrot.slane %v1452_v38, 4  ;;  %v327_v63 = vor.u32 %v326_v46, %v323_v42  ;;  %4095 = vmatprep.subr.bf16.mxu0 %v4431_v32  ;;  %v338_v27 = vrot.slane %v337_v59, 4  ;;  %v3455_v38 = vld [vmem:[%s4709_s30 + $0x48] sm:$0xf]  ;;  %v348_v44 = vshll.u32 %v4928_v10, 16 }
  0x48   : > { %v1471_v28 = vrot.slane %v1469_v58, 5  ;;  %v1466_v42 = vor.u32 %v1465_v20, %v1462_v19  ;;  %v1475_v46 = vrot.slane %v1473_v30, 4  ;;  %v1481_v49 = vrot.slane %v1479_v35, 5 }
  0x49   : > { %3968 = vmatpush3.bf16.msra.mxu1 %v4430_v60  ;;  %v1458_v2 = vsel %vm4754_vm2, %v1453_v50, %v1457_v40  ;;  %v342_v60 = vrot.slane %v340_v53, 5  ;;  %v328_v18 = vrot.slane %v327_v63, 4  ;;  %v354_v50 = vshll.u32 %v4931_v11, 16 }
  0x4a   : > { %3969 = vmatprep.subr.bf16.mxu1 %v4432_v37  ;;  %v3483_v15 = vcombine.low %v1448_v62, %v1458_v2  ;;  %4096 = vmatpush3.bf16.msra.mxu0 %v4431_v32  ;;  %v1467_v51 = vrot.slane %v1466_v42, 4  ;;  %v350_v53 = vrot.slane %v348_v44, 5  ;;  %v4435_v62 = vld [vmem:[%s5821_s1 + $0x170] sm:$0xff]   ;;  %v1476_v63 = vor.u32 %v1475_v46, %v1471_v28  ;;  %v4973_v42 = vld [vmem:[%s4709_s30 + $0x48] sm:$0xf] }
  0x4b   : > { %v333_v40 = vsel %vm4754_vm2, %v328_v18, %v332_v47  ;;  %v343_v3 = vsel %vm4754_vm2, %v338_v27, %v342_v60  ;;  %v347_v47 = vrot.slane %v345_v43, 4  ;;  %4097 = vmatprep.subr.bf16.mxu0 %v4433_v8  ;;  %v356_v1 = vrot.slane %v354_v50, 5  ;;  %v4960_v60 = vld [vmem:[%s4709_s30 + $0x50] sm:$0x1]  ;;  %v4965_v18 = vld [vmem:[%s5821_s1 + $0x80] sm:$0xff]  }
  0x4c   : > { %4076 = vmatmul.mubr.bf16.gmra.mrb[4].mxu0 %v3483_v15  ;;  %v358_v6 = vshrl.u32 %v4931_v11, 16  ;;  %v364_v2 = vshll.u32 %v4934_v21, 16  ;;  %v1472_v32 = vsel %vm4754_vm2, %v1467_v51, %v1471_v28  ;;  %v1484_v58 = vshrl.u32 %v3455_v38, 16  ;;  %v4437_v28 = vld [vmem:[%s5821_s1 + $0x178] sm:$0xff]   ;;  %v4979_v46 = vld [vmem:[%s4709_s30 + $0x4c] sm:$0xf] }
  0x4d   : > { %3970 = vmatpush3.bf16.msra.mxu1 %v4432_v37  ;;  %v3324_v37 = vcombine.low %v333_v40, %v343_v3  ;;  %v351_v59 = vor.u32 %v350_v53, %v347_v47  ;;  %v1487_v15 = vshll.u32 %v3455_v38, 16  ;;  %v1477_v19 = vrot.slane %v1476_v63, 4  ;;  %v4984_v53 = vld [vmem:[%s4709_s30 + $0x50] sm:$0x1]  ;;  %v3458_v63 = vld [vmem:[%s4709_s30 + $0x54] sm:$0xf] }
  0x4e   : > { %3971 = vmatprep.subr.bf16.mxu1 %v4434_v56  ;;  %v360_v20 = vrot.slane %v358_v6, 4  ;;  %v1493_v27 = vshll.u32 %v4947_v45, 16  ;;  %4098 = vmatpush3.bf16.msra.mxu0 %v4433_v8  ;;  %v1486_v35 = vrot.slane %v1484_v58, 4  ;;  %v1497_v40 = vshrl.u32 %v4947_v45, 16  ;;  %5831 = vst [vmem:[#allocation9_spill] sm:$0xff] %v4984_v53 }
  0x4f   : > { %3951 = vmatprep.mubr.bf16.mxu1 %v3324_v37  ;;  %v352_v30 = vrot.slane %v351_v59, 4  ;;  %v1489_v38 = vrot.slane %v1487_v15, 5  ;;  %4099 = vmatprep.subr.bf16.mxu0 %v4435_v62  ;;  %v1482_v43 = vsel %vm4754_vm2, %v1477_v19, %v1481_v49  ;;  %v1503_v8 = vshll.u32 %v4960_v60, 16  ;;  %v4995_v15 = vld [vmem:[%s5821_s1 + $0x180] sm:$0xff]  }
  0x50   : > { %v361_v44 = vor.u32 %v360_v20, %v356_v1  ;;  %v1495_v3 = vrot.slane %v1493_v27, 5  ;;  %v3484_v50 = vcombine.low %v1472_v32, %v1482_v43  ;;  %v1499_v47 = vrot.slane %v1497_v40, 4 }
  0x51   : > { %3972 = vmatpush3.bf16.msra.mxu1 %v4434_v56  ;;  %v366_v56 = vrot.slane %v364_v2, 5  ;;  %v357_v37 = vsel %vm4754_vm2, %v352_v30, %v356_v1  ;;  %v1490_v51 = vor.u32 %v1489_v38, %v1486_v35  ;;  %v1505_v49 = vrot.slane %v1503_v8, 5  ;;  %v5001_v30 = vld [vmem:[%s4709_s30 + $0x58] sm:$0xf]  ;;  %v5009_v8 = vld [vmem:[%s4709_s30 + $0x54] sm:$0xf] }
  0x52   : > { %3973 = vmatprep.subr.bf16.mxu1 %v4436_v22  ;;  %v362_v6 = vrot.slane %v361_v44, 4  ;;  %v369_v2 = vshrl.u32 %v4973_v42, 16  ;;  %v372_v59 = vshll.u32 %v4973_v42, 16  ;;  %4100 = vmatpush3.bf16.msra.mxu0 %v4435_v62  ;;  %v1500_v1 = vor.u32 %v1499_v47, %v1495_v3  ;;  %v5006_v44 = vld [vmem:[%s4709_s30 + $0x5c] sm:$0x1] }
  0x53   : > { %4079 = vmatprep.mubr.bf16.mxu0 %v3484_v50  ;;  %v378_v32 = vshll.u32 %v4979_v46, 16  ;;  %v382_v58 = vshrl.u32 %v4979_v46, 16  ;;  %4101 = vmatprep.subr.bf16.mxu0 %v4437_v28  ;;  %v388_v27 = vshll.u32 %v4984_v53, 16  ;;  %v5036_v53 = vld [vmem:[%s4709_s30 + $0x68] sm:$0x1] }
  0x54   : > { %v367_v19 = vsel %vm4754_vm2, %v362_v6, %v366_v56  ;;  %v371_v62 = vrot.slane %v369_v2, 4  ;;  %v374_v20 = vrot.slane %v372_v59, 5  ;;  %v1501_v40 = vrot.slane %v1500_v1, 4  ;;  %v5012_v6 = vld [vmem:[%s4709_s30 + $0x58] sm:$0xf] }
  0x55   : > { %3974 = vmatpush3.bf16.msra.mxu1 %v4436_v22  ;;  %v1491_v22 = vrot.slane %v1490_v51, 4  ;;  %v3325_v35 = vcombine.low %v357_v37, %v367_v19  ;;  %v380_v43 = vrot.slane %v378_v32, 5  ;;  %v384_v51 = vrot.slane %v382_v58, 4 }
  0x56   : > { %3991 = vmatprep.subr.bf16.mxu1 %v4965_v18  ;;  %v375_v50 = vor.u32 %v374_v20, %v371_v62  ;;  %v390_v47 = vrot.slane %v388_v27, 5  ;;  %v1508_v56 = vshrl.u32 %v3458_v63, 16  ;;  %4102 = vmatpush3.bf16.msra.mxu0 %v4437_v28  ;;  %v1506_v37 = vsel %vm4754_vm2, %v1501_v40, %v1505_v49  ;;  %v5021_v20 = vld [vmem:[%s4709_s30 + $0x5c] sm:$0x1] }
  0x57   : > { %v1496_v38 = vsel %vm4754_vm2, %v1491_v22, %v1495_v3  ;;  %3952 = vmatmul.mubr.bf16.gmra.mrb[8].mxu1 %v3325_v35  ;;  %v1511_v3 = vshll.u32 %v3458_v63, 16  ;;  %v1517_v2 = vshll.u32 %v5001_v30, 16  ;;  %v1521_v59 = vshrl.u32 %v5001_v30, 16  ;;  %4119 = vmatprep.subr.bf16.mxu0 %v4995_v15  ;;  %v3461_v63 = vld [vmem:[%s4709_s30 + $0x60] sm:$0xf] }
  0x58   : > { %v3485_v22 = vcombine.low %v1496_v38, %v1506_v37  ;;  %v376_v1 = vrot.slane %v375_v50, 4  ;;  %v385_v32 = vor.u32 %v384_v51, %v380_v43  ;;  %v1510_v58 = vrot.slane %v1508_v56, 4 }
  0x59   : > { %v1513_v28 = vrot.slane %v1511_v3, 5  ;;  %v1519_v19 = vrot.slane %v1517_v2, 5  ;;  %v1523_v62 = vrot.slane %v1521_v59, 4  ;;  %v1527_v49 = vshll.u32 %v5006_v44, 16  ;;  %v5030_v3 = vld [vmem:[%s4709_s30 + $0x64] sm:$0xf] }
  0x5a   : > { %4080 = vmatmul.mubr.bf16.gmra.mrb[8].mxu0 %v3485_v22  ;;  %v381_v27 = vsel %vm4754_vm2, %v376_v1, %v380_v43  ;;  %v386_v35 = vrot.slane %v385_v32, 4  ;;  %v393_v38 = vshrl.u32 %v5009_v8, 16  ;;  %v396_v40 = vshll.u32 %v5009_v8, 16 }
  0x5b   : > { %v1514_v50 = vor.u32 %v1513_v28, %v1510_v58  ;;  %v1524_v51 = vor.u32 %v1523_v62, %v1519_v19  ;;  %v1529_v56 = vrot.slane %v1527_v49, 5  ;;  %v402_v37 = vshll.u32 %v5012_v6, 16  ;;  %v3496_v58 = vld [vmem:[%s4709_s30 + $0xc] sm:$0xe] }
  0x5c   : > { %v391_v2 = vsel %vm4754_vm2, %v386_v35, %v390_v47  ;;  %v395_v59 = vrot.slane %v393_v38, 4  ;;  %v398_v22 = vrot.slane %v396_v40, 5  ;;  %v406_v43 = vshrl.u32 %v5012_v6, 16 }
  0x5d   : > { %v3326_v1 = vcombine.low %v381_v27, %v391_v2  ;;  %v1515_v32 = vrot.slane %v1514_v50, 4  ;;  %v1525_v26 = vrot.slane %v1524_v51, 4  ;;  %v404_v39 = vrot.slane %v402_v37, 5 }
  0x5e   : > { %v399_v28 = vor.u32 %v398_v22, %v395_v59  ;;  %v408_v62 = vrot.slane %v406_v43, 4  ;;  %v412_v49 = vshll.u32 %v5021_v20, 16  ;;  %v1532_v21 = vshrl.u32 %v3461_v63, 16 }
  0x5f   : > { %3955 = vmatprep.mubr.bf16.mxu1 %v3326_v1  ;;  %v1520_v47 = vsel %vm4754_vm2, %v1515_v32, %v1519_v19  ;;  %v1530_v35 = vsel %vm4754_vm2, %v1525_v26, %v1529_v56  ;;  %v1535_v38 = vshll.u32 %v3461_v63, 16  ;;  %v1541_v27 = vshll.u32 %v5030_v3, 16 }
  0x60   : > { %v3486_v40 = vcombine.low %v1520_v47, %v1530_v35  ;;  %v400_v50 = vrot.slane %v399_v28, 4  ;;  %v409_v51 = vor.u32 %v408_v62, %v404_v39  ;;  %v414_v37 = vrot.slane %v412_v49, 5  ;;  %v3497_v49 = vld [vmem:[%s4709_s30 + $0x18] sm:$0xe]  ;;  %v3498_v47 = vld [vmem:[%s4709_s30 + $0x24] sm:$0xe] }
  0x61   : > { %v1534_v2 = vrot.slane %v1532_v21, 4  ;;  %v1537_v59 = vrot.slane %v1535_v38, 5  ;;  %v1543_v22 = vrot.slane %v1541_v27, 5  ;;  %v1545_v43 = vshrl.u32 %v5030_v3, 16 }
  0x62   : > { %4083 = vmatprep.mubr.bf16.mxu0 %v3486_v40  ;;  %v405_v19 = vsel %vm4754_vm2, %v400_v50, %v404_v39  ;;  %v410_v1 = vrot.slane %v409_v51, 4  ;;  %v1551_v26 = vshll.u32 %v5036_v53, 16  ;;  %v3504_v63 = vrot.slane %v3496_v58, 9 }
  0x63   : > { %v1538_v56 = vor.u32 %v1537_v59, %v1534_v2  ;;  %v1547_v32 = vrot.slane %v1545_v43, 4  ;;  %v1799_v21 = vrot.slane %v4733_v23, 5  ;;  %v3336_v39 = vcombine.low %v4718_v12, %v4721_v13 }
  0x64   : > { %v415_v62 = vsel %vm4754_vm2, %v410_v1, %v414_v37  ;;  %v1553_v27 = vrot.slane %v1551_v26, 5  ;;  %v1813_v37 = vrot.slane %v4822_v52, 5  ;;  %v5834_v12 = vrot.slane %v4778_v61, 5  ;;  %v5101_v61 = vld [vmem:[%s4709_s30 + $0x48] sm:$0xe] }
  0x65   : > { %v3327_v35 = vcombine.low %v405_v19, %v415_v62  ;;  %v1539_v58 = vrot.slane %v1538_v56, 4  ;;  %v1548_v38 = vor.u32 %v1547_v32, %v1543_v22  ;;  %v1800_v40 = vsel %vm5051_vm5, %v3504_v63, %v1799_v21  ;;  %v3499_v63 = vld [vmem:[%s4709_s30 + $0x30] sm:$0xe] }
  0x66   : > { %v1801_v50 = vrot.slane %v1799_v21, 4  ;;  %v1808_v13 = vrot.slane %v5834_v12, 4  ;;  %v1809_v2 = vrot.slane %v4790_v7, 5  ;;  %v5835_v59 = vrot.slane %v4736_v24, 5 }
  0x67   : > { %3956 = vmatmul.mubr.bf16.gmra.mrb[12].mxu1 %v3327_v35  ;;  %v1544_v23 = vsel %vm4754_vm2, %v1539_v58, %v1543_v22  ;;  %v1549_v51 = vrot.slane %v1548_v38, 4  ;;  %v3505_v22 = vrot.slane %v3497_v49, 9  ;;  %v3506_v26 = vrot.slane %v3498_v47, 9  ;;  %v3500_v49 = vld [vmem:[%s4709_s30 + $0x3c] sm:$0xe]  ;;  %v4442_v35 = vld [vmem:[%s5821_s1 + $0x88] sm:$0xff]  }
  0x68   : > { %3975 = vmatprep.mubr.bf16.mxu1 %v3336_v39  ;;  %v1803_v43 = vsel %vm5051_vm5, %v1801_v50, %v5835_v59  ;;  %v1815_v56 = vrot.slane %v1813_v37, 4  ;;  %v1816_v32 = vrot.slane %v4827_v57, 5  ;;  %v835_v7 = vrot.slane %v4724_v14, 5 }
  0x69   : > { %v1554_v19 = vsel %vm4754_vm2, %v1549_v51, %v1553_v27  ;;  %v3528_v1 = vcombine.low %v1800_v40, %v1803_v43  ;;  %v842_v24 = vrot.slane %v4770_v54, 5  ;;  %v3337_v21 = vcombine.low %v4747_v34, %v4760_v41  ;;  %v4448_v43 = vld [vmem:[%s5821_s1 + $0x98] sm:$0xff]  }
  0x6a   : > { %v3487_v52 = vcombine.low %v1544_v23, %v1554_v19  ;;  %v1810_v62 = vsel %vm5051_vm5, %v1808_v13, %v1809_v2  ;;  %v3338_v39 = vcombine.low %v4799_v25, %v4807_v33  ;;  %v5836_v47 = vmov %v5834_v12  ;;  %v5111_v23 = vld [vmem:[%s4709_s30 + $0x54] sm:$0xe] }
  0x6b   : > { %v1807_v57 = vsel %vm5051_vm5, %v3505_v22, %v5836_v47  ;;  %v3507_v34 = vrot.slane %v3499_v63, 9  ;;  %v1820_v41 = vrot.slane %v4853_v31, 5  ;;  %v1827_v58 = vrot.slane %v4910_v48, 5  ;;  %v4443_v48 = vld [vmem:[%s5821_s1 + $0x188] sm:$0xff]  }
  0x6c   : > { %4084 = vmatmul.mubr.bf16.gmra.mrb[12].mxu0 %v3487_v52  ;;  %v1814_v25 = vsel %vm5051_vm5, %v3506_v26, %v1813_v37  ;;  %v1817_v33 = vsel %vm5051_vm5, %v1815_v56, %v1816_v32  ;;  %v1823_v38 = vrot.slane %v4872_v55, 5  ;;  %v3508_v27 = vrot.slane %v3500_v49, 9  ;;  %v5114_v55 = vld [vmem:[%s4709_s30 + $0x60] sm:$0xe]  ;;  %v5141_v56 = vld [vmem:[%s4709_s30 + $0x4] sm:$0xf] }
  0x6d   : > { %4103 = vmatprep.mubr.bf16.mxu0 %v3528_v1  ;;  %v1830_v40 = vrot.slane %v4919_v0, 5  ;;  %v1834_v50 = vrot.slane %v4947_v45, 5  ;;  %v3529_v31 = vcombine.low %v1807_v57, %v1810_v62  ;;  %v3530_v51 = vcombine.low %v1814_v25, %v1817_v33  ;;  %v4452_v49 = vld [vmem:[%s5821_s1 + $0xa0] sm:$0xff]   ;;  %v5196_v45 = vld [vmem:[%s4709_s30 + $0x18] sm:$0xe] }
  0x6e   : > { %v1822_v37 = vrot.slane %v1820_v41, 4  ;;  %v1829_v12 = vrot.slane %v1827_v58, 4  ;;  %v3339_v0 = vcombine.low %v4836_v4, %v4843_v16  ;;  %v1821_v13 = vsel %vm5051_vm5, %v3507_v34, %v1820_v41  ;;  %v5164_v41 = vld [vmem:[%s4709_s30 + $0x10] sm:$0xf] }
  0x6f   : > { %3976 = vmatmul.mubr.bf16.vlgmr.msra.gmra.mrb[0].mxu1 %v3337_v21  ;;  %v3340_v2 = vcombine.low %v4879_v5, %v4885_v9  ;;  %v3509_v59 = vrot.slane %v5101_v61, 9  ;;  %v1836_v4 = vrot.slane %v1834_v50, 4  ;;  %v1837_v19 = vrot.slane %v4960_v60, 5  ;;  %v4447_v5 = vld [vmem:[%s5821_s1 + $0x190] sm:$0xff]   ;;  %v803_v21 = vld [vmem:[%s4709_s30] sm:$0xe] }
  0x70   : > { %3992 = vmatpush3.bf16.msra.mxu1 %v4965_v18  ;;  %3979 = vmatprep.mubr.bf16.mxu1 %v3338_v39  ;;  %v4446_v18 = vld [vmem:[%s5821_s1 + $0x90] sm:$0xff]   ;;  %v3510_v1 = vrot.slane %v5111_v23, 9  ;;  %v1841_v22 = vrot.slane %v5001_v30, 5  ;;  %v1844_v26 = vrot.slane %v5006_v44, 5  ;;  %v3511_v63 = vrot.slane %v5114_v55, 9 }
  0x71   : > { %3993 = vmatprep.subr.bf16.mxu1 %v4442_v35  ;;  %v1848_v52 = vrot.slane %v5030_v3, 5  ;;  %v832_v60 = vrot.slane %v5141_v56, 5  ;;  %v1824_v30 = vsel %vm5051_vm5, %v1822_v37, %v1823_v38  ;;  %v1828_v32 = vsel %vm5051_vm5, %v3508_v27, %v1827_v58  ;;  %v806_v61 = vld [vmem:[%s4709_s30 + $0x24] sm:$0xe]  ;;  %v808_v56 = vld [vmem:[%s4709_s30 + $0x3c] sm:$0xe] }
  0x72   : > { %v1831_v44 = vsel %vm5051_vm5, %v1829_v12, %v1830_v40  ;;  %v3531_v62 = vcombine.low %v1821_v13, %v1824_v30  ;;  %v1843_v47 = vrot.slane %v1841_v22, 4  ;;  %v1851_v57 = vrot.slane %v5036_v53, 5  ;;  %v4454_v40 = vld [vmem:[%s5821_s1 + $0xa8] sm:$0xff]   ;;  %v4504_v30 = vld [vmem:[%s4709_s30 + $0x1c] sm:$0xf]  ;;  %v4459_v53 = vld [vmem:[%s5821_s1 + $0x1b0] sm:$0xff]  }
  0x73   : > { %v3532_v39 = vcombine.low %v1828_v32, %v1831_v44  ;;  %v3352_v34 = vrot.slane %v803_v21, 9  ;;  %v839_v58 = vrot.slane %v5164_v41, 5  ;;  %v853_v25 = vrot.slane %v4843_v16, 5  ;;  %v810_v41 = vld [vmem:[%s4709_s30 + $0x54] sm:$0xe] }
  0x74   : > { %4104 = vmatmul.mubr.bf16.vlgmr.msra.gmra.mrb[0].mxu0 %v3529_v31  ;;  %3994 = vmatpush3.bf16.msra.mxu1 %v4442_v35  ;;  %v5161_v35 = vrot.slane %v1848_v52, 4  ;;  %v834_v33 = vrot.slane %v832_v60, 4  ;;  %v856_v38 = vrot.slane %v4846_v17, 5  ;;  %v3341_v27 = vcombine.low %v4928_v10, %v4931_v11 }
  0x75   : > { %4120 = vmatpush3.bf16.msra.mxu0 %v4995_v15  ;;  %4107 = vmatprep.mubr.bf16.mxu0 %v3530_v51  ;;  %v4449_v15 = vld [vmem:[%s5821_s1 + $0x198] sm:$0xff]   ;;  %v3342_v31 = vcombine.low %v4973_v42, %v4979_v46  ;;  %v3355_v16 = vrot.slane %v806_v61, 9  ;;  %v855_v23 = vrot.slane %v853_v25, 4  ;;  %v1835_v17 = vsel %vm5051_vm5, %v3509_v59, %v1834_v50  ;;  %v4453_v51 = vld [vmem:[%s5821_s1 + $0x1a0] sm:$0xff]  }
  0x76   : > { %4121 = vmatprep.subr.bf16.mxu0 %v4443_v48  ;;  %3995 = vmatprep.subr.bf16.mxu1 %v4446_v18  ;;  %v1838_v10 = vsel %vm5051_vm5, %v1836_v4, %v1837_v19  ;;  %v1842_v42 = vsel %vm5051_vm5, %v3510_v1, %v1841_v22  ;;  %v1845_v37 = vsel %vm5051_vm5, %v1843_v47, %v1844_v26  ;;  %v860_v13 = vrot.slane %v4885_v9, 5  ;;  %v807_v4 = vld [vmem:[%s4709_s30 + $0x30] sm:$0xe]  ;;  %v4455_v1 = vld [vmem:[%s5821_s1 + $0x1a8] sm:$0xff]  }
  0x77   : > { %3980 = vmatmul.mubr.bf16.gmra.mrb[4].mxu1 %v3339_v0  ;;  %v5200_v50 = vsel %vm5051_vm5, %v3355_v16, %v853_v25  ;;  %v5204_v12 = vsel %vm5051_vm5, %v855_v23, %v856_v38  ;;  %v3343_v59 = vcombine.low %v5009_v8, %v5012_v6  ;;  %v863_v19 = vrot.slane %v4895_v29, 5  ;;  %v4458_v29 = vld [vmem:[%s5821_s1 + $0xb0] sm:$0xff]   ;;  %v4461_v16 = vld [vmem:[%s5821_s1 + $0x1b8] sm:$0xff]  }
  0x78   : > { %3996 = vmatpush3.bf16.msra.mxu1 %v4446_v18  ;;  %3983 = vmatprep.mubr.bf16.mxu1 %v3340_v2  ;;  %v3379_v18 = vcombine.low %v5200_v50, %v5204_v12  ;;  %v3533_v2 = vcombine.low %v1835_v17, %v1838_v10  ;;  %v3534_v9 = vcombine.low %v1842_v42, %v1845_v37  ;;  %v3356_v8 = vrot.slane %v807_v4, 9  ;;  %v5838_v38 = vld [vmem:[#allocation9_spill] sm:$0xff]  ;;  %v4475_v12 = vld [vmem:[%s5821_s1 + $0xe0] sm:$0xff]  }
  0x79   : > { %4122 = vmatpush3.bf16.msra.mxu0 %v4443_v48  ;;  %3997 = vmatprep.subr.bf16.mxu1 %v4448_v43  ;;  %v5180_v48 = vld [vmem:[%s4709_s30 + $0xc] sm:$0xe]  ;;  %v833_v22 = vsel %vm5051_vm5, %v3352_v34, %v832_v60  ;;  %v836_v26 = vsel %vm5051_vm5, %v834_v33, %v835_v7  ;;  %v846_v32 = vrot.slane %v4504_v30, 5  ;;  %v867_v44 = vrot.slane %v4931_v11, 5  ;;  %v5837_v60 = vld [vmem:[#allocation8_spill] sm:$0xff]  ;;  %v4460_v7 = vld [vmem:[%s5821_s1 + $0xb8] sm:$0xff]  }
  0x7a   : > { %4123 = vmatprep.subr.bf16.mxu0 %v4447_v5  ;;  %v3353_v0 = vrot.slane %v5180_v48, 9  ;;  %v870_v21 = vrot.slane %v5837_v60, 5  ;;  %v1849_v11 = vsel %vm5051_vm5, %v3511_v63, %v1848_v52  ;;  %v1852_v3 = vsel %vm5051_vm5, %v5161_v35, %v1851_v57  ;;  %v809_v35 = vld [vmem:[%s4709_s30 + $0x48] sm:$0xe] }
  0x7b   : > { %v869_v25 = vrot.slane %v867_v44, 4  ;;  %v3376_v55 = vcombine.low %v833_v22, %v836_v26  ;;  %v848_v52 = vrot.slane %v846_v32, 4  ;;  %v874_v61 = vrot.slane %v4979_v46, 5  ;;  %v5331_v26 = vld [vmem:[%s4709_s30 + $0x20] sm:$0x1]  ;;  %v4474_v50 = vld [vmem:[%s4709_s30 + $0x48] sm:$0xff]  }
  0x7c   : > { %4108 = vmatmul.mubr.bf16.gmra.mrb[4].mxu0 %v3531_v62  ;;  %3998 = vmatpush3.bf16.msra.mxu1 %v4448_v43  ;;  %v841_v43 = vrot.slane %v839_v58, 4  ;;  %v3354_v62 = vrot.slane %v5196_v45, 9  ;;  %v840_v46 = vsel %vm5051_vm5, %v3353_v0, %v839_v58  ;;  %v881_v10 = vrot.slane %v5012_v6, 5  ;;  %v4463_v6 = vld [vmem:[%s5821_s1 + $0xc0] sm:$0xff]  }
  0x7d   : > { %4124 = vmatpush3.bf16.msra.mxu0 %v4447_v5  ;;  %4111 = vmatprep.mubr.bf16.mxu0 %v3532_v39  ;;  %v862_v5 = vrot.slane %v860_v13, 4  ;;  %v3357_v39 = vrot.slane %v808_v56, 9  ;;  %v5266_v33 = vsel %vm5051_vm5, %v869_v25, %v870_v21  ;;  %v876_v48 = vrot.slane %v874_v61, 4  ;;  %v4467_v56 = vld [vmem:[%s5821_s1 + $0x1c8] sm:$0xff]  }
  0x7e   : > { %4125 = vmatprep.subr.bf16.mxu0 %v4449_v15  ;;  %3999 = vmatprep.subr.bf16.mxu1 %v4452_v49  ;;  %v843_v23 = vsel %vm5051_vm5, %v841_v43, %v842_v24  ;;  %v847_v17 = vsel %vm5051_vm5, %v3354_v62, %v846_v32  ;;  %v884_v58 = vrot.slane %v5021_v20, 5  ;;  %v3359_v37 = vrot.slane %v810_v41, 9  ;;  %v4466_v43 = vld [vmem:[%s5821_s1 + $0xc8] sm:$0xff]   ;;  %v3595_v62 = vld [vmem:[%s4709_s30 + $0x24] sm:$0xf] }
  0x7f   : > { %3984 = vmatmul.mubr.bf16.gmra.mrb[8].mxu1 %v3341_v27  ;;  %v5241_v14 = vsel %vm5051_vm5, %v862_v5, %v863_v19  ;;  %v5262_v63 = vsel %vm5051_vm5, %v3357_v39, %v867_v44  ;;  %v877_v27 = vrot.slane %v5838_v38, 5  ;;  %v883_v45 = vrot.slane %v881_v10, 4  ;;  %v4465_v19 = vld [vmem:[%s5821_s1 + $0x1c0] sm:$0xff]   ;;  %v4469_v44 = vld [vmem:[%s5821_s1 + $0xd0] sm:$0xff]   ;;  %v5352_v25 = vld [vmem:[%s4709_s30 + $0x28] sm:$0xf] }
  0x80   : > { %4000 = vmatpush3.bf16.msra.mxu1 %v4452_v49  ;;  %3987 = vmatprep.mubr.bf16.mxu1 %v3342_v31  ;;  %v4505_v49 = vld [vmem:[%s4709_s30 + $0x20] sm:$0x1]  ;;  %v3381_v57 = vcombine.low %v5262_v63, %v5266_v33  ;;  %v3358_v31 = vrot.slane %v809_v35, 9  ;;  %v3377_v0 = vcombine.low %v840_v46, %v843_v23  ;;  %v4464_v5 = vld [vmem:[%s4709_s30 + $0x24] sm:$0xff]   ;;  %v4471_v39 = vld [vmem:[%s5821_s1 + $0x1d0] sm:$0xff]  }
  0x81   : > { %4126 = vmatpush3.bf16.msra.mxu0 %v4449_v15  ;;  %4001 = vmatprep.subr.bf16.mxu1 %v4454_v40  ;;  %v5237_v15 = vsel %vm5051_vm5, %v3356_v8, %v860_v13  ;;  %v849_v47 = vrot.slane %v4505_v49, 5  ;;  %v5301_v24 = vsel %vm5051_vm5, %v876_v48, %v877_v27  ;;  %v5310_v13 = vsel %vm5051_vm5, %v3359_v37, %v881_v10  ;;  %v4470_v35 = vld [vmem:[%s4709_s30 + $0x3c] sm:$0xff]   ;;  %v5371_v46 = vld [vmem:[%s4709_s30 + $0x34] sm:$0xf]  ;;  %v5394_v37 = vld [vmem:[%s4709_s30 + $0x38] sm:$0x1] }
  0x82   : > { %4127 = vmatprep.subr.bf16.mxu0 %v4453_v51  ;;  %v3380_v34 = vcombine.low %v5237_v15, %v5241_v14  ;;  %v5297_v54 = vsel %vm5051_vm5, %v3358_v31, %v874_v61  ;;  %v4473_v38 = vld [vmem:[%s5821_s1 + $0x1d8] sm:$0xff]   ;;  %v2364_v27 = vshll.u32 %v5352_v25, 16  ;;  %v2388_v41 = vshll.u32 %v5371_v46, 16 }
  0x83   : > { %v850_v42 = vsel %vm5051_vm5, %v848_v52, %v849_v47  ;;  %v3382_v20 = vcombine.low %v5297_v54, %v5301_v24  ;;  %v2358_v52 = vshll.u32 %v3595_v62, 16  ;;  %v2392_v10 = vshrl.u32 %v5371_v46, 16  ;;  %v4479_v54 = vld [vmem:[%s5821_s1 + $0x1e8] sm:$0xff]   ;;  %v4481_v24 = vld [vmem:[%s5821_s1 + $0xf0] sm:$0xff]  }
  0x84   : > { %4112 = vmatmul.mubr.bf16.gmra.mrb[8].mxu0 %v3533_v2  ;;  %4002 = vmatpush3.bf16.msra.mxu1 %v4454_v40  ;;  %v3535_v40 = vcombine.low %v1849_v11, %v1852_v3  ;;  %v3378_v2 = vcombine.low %v847_v17, %v850_v42  ;;  %v4472_v11 = vld [vmem:[%s5821_s1 + $0xd8] sm:$0xff]   ;;  %v5355_v3 = vld [vmem:[%s4709_s30 + $0x2c] sm:$0x1]  ;;  %v2780_v36 = vrot.slane %v5371_v46, 5 }
  0x85   : > { %4128 = vmatpush3.bf16.msra.mxu0 %v4453_v51  ;;  %4115 = vmatprep.mubr.bf16.mxu0 %v3534_v9  ;;  %v4462_v51 = vld [vmem:[%s4709_s30 + $0x18] sm:$0xff]   ;;  %v2374_v48 = vshll.u32 %v5355_v3, 16  ;;  %v2776_v46 = vrot.slane %v5355_v3, 5 }
  0x86   : > { %4129 = vmatprep.subr.bf16.mxu0 %v4455_v1  ;;  %4003 = vmatprep.subr.bf16.mxu1 %v4458_v29  ;;  %v5326_v9 = vld [vmem:[%s4709_s30 + $0x1c] sm:$0xf] }
  0x87   : > { %3988 = vmatmul.mubr.bf16.gmra.mrb[12].mxu1 %v3343_v59  ;;  %v5314_v59 = vsel %vm5051_vm5, %v883_v45, %v884_v58  ;;  %v2340_v30 = vshll.u32 %v5326_v9, 16  ;;  %v2344_v32 = vshrl.u32 %v5326_v9, 16  ;;  %v4477_v58 = vld [vmem:[%s5821_s1 + $0x1e0] sm:$0xff]  }
  0x88   : > { %4004 = vmatpush3.bf16.msra.mxu1 %v4458_v29  ;;  %4007 = vmatprep.mubr.bf16.mxu1 %v3376_v55  ;;  %v3383_v4 = vcombine.low %v5310_v13, %v5314_v59  ;;  %v4468_v29 = vld [vmem:[%s4709_s30 + $0x30] sm:$0xff]   ;;  %v2355_v55 = vshrl.u32 %v3595_v62, 16  ;;  %v5438_v62 = vrot.slane %v2374_v48, 5 }
  0x89   : > { %4130 = vmatpush3.bf16.msra.mxu0 %v4455_v1  ;;  %4005 = vmatprep.subr.bf16.mxu1 %v4460_v7  ;;  %v3592_v1 = vld [vmem:[%s4709_s30 + $0x18] sm:$0xf]  ;;  %v5349_v49 = vrot.slane %v2340_v30, 5  ;;  %v2346_v47 = vrot.slane %v2344_v32, 4 }
  0x8a   : > { %4131 = vmatprep.subr.bf16.mxu0 %v4459_v53  ;;  %v2331_v22 = vshrl.u32 %v3592_v1, 16  ;;  %v2334_v8 = vshll.u32 %v3592_v1, 16  ;;  %v2357_v14 = vrot.slane %v2355_v55, 4  ;;  %v4480_v1 = vld [vmem:[%s4709_s30 + $0x60] sm:$0xff]   ;;  %v4484_v55 = vld [vmem:[%s5821_s1 + $0xf8] sm:$0xff]  }
  0x8c   : > { %4116 = vmatmul.mubr.bf16.gmra.mrb[12].mxu0 %v3535_v40  ;;  %4006 = vmatpush3.bf16.msra.mxu1 %v4460_v7  ;;  %v2333_v60 = vrot.slane %v2331_v22, 4  ;;  %v2336_v21 = vrot.slane %v2334_v8, 5  ;;  %v2350_v7 = vshll.u32 %v5331_v26, 16  ;;  %v2368_v40 = vshrl.u32 %v5352_v25, 16 }
  0x8d   : > { %4132 = vmatpush3.bf16.msra.mxu0 %v4459_v53  ;;  %4135 = vmatprep.mubr.bf16.mxu0 %v4462_v51  ;;  %v3598_v53 = vld [vmem:[%s4709_s30 + $0x30] sm:$0xf]  ;;  %v5391_v51 = vrot.slane %v2364_v27, 5  ;;  %v5409_v8 = vrot.slane %v2388_v41, 5  ;;  %v5456_v27 = vld [vmem:[%s4709_s30 + $0x44] sm:$0x1] }
  0x8e   : > { %4133 = vmatprep.subr.bf16.mxu0 %v4461_v16  ;;  %4023 = vmatprep.subr.bf16.mxu1 %v4463_v6  ;;  %v2337_v61 = vor.u32 %v2336_v21, %v2333_v60  ;;  %v2379_v31 = vshrl.u32 %v3598_v53, 16  ;;  %v5378_v15 = vrot.slane %v2350_v7, 5  ;;  %v2382_v17 = vshll.u32 %v3598_v53, 16 }
  0x8f   : > { %4008 = vmatmul.mubr.bf16.vlgmr.msra.gmra.mrb[0].mxu1 %v3377_v0  ;;  %v2370_v42 = vrot.slane %v2368_v40, 4  ;;  %v3601_v0 = vld [vmem:[%s4709_s30 + $0x3c] sm:$0xf] }
  0x90   : > { %4024 = vmatpush3.bf16.msra.mxu1 %v4463_v6  ;;  %4011 = vmatprep.mubr.bf16.mxu1 %v3378_v2  ;;  %v5384_v23 = vrot.slane %v2337_v61, 4  ;;  %v5398_v45 = vrot.slane %v2379_v31, 4  ;;  %v2384_v22 = vrot.slane %v2382_v17, 5  ;;  %v2403_v32 = vshrl.u32 %v3601_v0, 16  ;;  %v4482_v31 = vld [vmem:[%s4709_s30 + $0x6c] sm:$0xff]  }
  0x91   : > { %4134 = vmatpush3.bf16.msra.mxu0 %v4461_v16  ;;  %4025 = vmatprep.subr.bf16.mxu1 %v4466_v43  ;;  %v4478_v16 = vld [vmem:[%s5821_s1 + $0xe8] sm:$0xff]   ;;  %v2371_v30 = vor.u32 %v2370_v42, %v5391_v51  ;;  %v2406_v63 = vshll.u32 %v3601_v0, 16 }
  0x92   : > { %4151 = vmatprep.subr.bf16.mxu0 %v4465_v19  ;;  %v2385_v53 = vor.u32 %v2384_v22, %v5398_v45  ;;  %v2405_v40 = vrot.slane %v2403_v32, 4  ;;  %v4487_v45 = vld [vmem:[%s4709_s30 + $0x18] sm:$0xff]   ;;  %v5494_v32 = vld [vmem:[%s4709_s30 + $0x64] sm:$0xf] }
  0x93   : > { %v5449_v61 = vrot.slane %v2371_v30, 4  ;;  %v3610_v30 = vld [vmem:[%s4709_s30 + $0x60] sm:$0xf] }
  0x94   : > { %4136 = vmatmul.mubr.bf16.vlgmr.msra.gmra.mrb[0].mxu0 %v4464_v5  ;;  %4026 = vmatpush3.bf16.msra.mxu1 %v4466_v43  ;;  %v5402_v43 = vld [vmem:[%s4709_s30 + $0x40] sm:$0xf]  ;;  %v2394_v5 = vrot.slane %v2392_v10, 4  ;;  %v2386_v41 = vrot.slane %v2385_v53, 4  ;;  %v2422_v10 = vshll.u32 %v5456_v27, 16 }
  0x95   : > { %4152 = vmatpush3.bf16.msra.mxu0 %v4465_v19  ;;  %4139 = vmatprep.mubr.bf16.mxu0 %v4468_v29  ;;  %v4476_v19 = vld [vmem:[%s4709_s30 + $0x54] sm:$0xff]   ;;  %v2398_v29 = vshll.u32 %v5394_v37, 16  ;;  %v2412_v33 = vshll.u32 %v5402_v43, 16  ;;  %v5522_v53 = vld [vmem:[%s4709_s30 + $0x5c] sm:$0x1] }
  0x96   : > { %4153 = vmatprep.subr.bf16.mxu0 %v4467_v56  ;;  %4027 = vmatprep.subr.bf16.mxu1 %v4469_v44 }
  0x97   : > { %4012 = vmatmul.mubr.bf16.gmra.mrb[4].mxu1 %v3379_v18  ;;  %v2347_v18 = vor.u32 %v2346_v47, %v5349_v49 }
  0x98   : > { %4028 = vmatpush3.bf16.msra.mxu1 %v4469_v44  ;;  %4015 = vmatprep.mubr.bf16.mxu1 %v3380_v34  ;;  %v2360_v34 = vrot.slane %v2358_v52, 5  ;;  %v5420_v44 = vld [vmem:[%s4709_s30 + $0x4c] sm:$0xf] }
  0x99   : > { %4154 = vmatpush3.bf16.msra.mxu0 %v4467_v56  ;;  %4029 = vmatprep.subr.bf16.mxu1 %v4472_v11  ;;  %v5396_v6 = vrot.slane %v2347_v18, 4  ;;  %v3604_v56 = vld [vmem:[%s4709_s30 + $0x48] sm:$0xf]  ;;  %v2436_v7 = vshll.u32 %v5420_v44, 16  ;;  %v2440_v47 = vshrl.u32 %v5420_v44, 16  ;;  %v4486_v52 = vld [vmem:[%s4709_s30 + $0xc] sm:$0xff]  }
  0x9a   : > { %4155 = vmatprep.subr.bf16.mxu0 %v4471_v39  ;;  %v2361_v2 = vor.u32 %v2360_v34, %v2357_v14 }
  0x9b   : > { %v2353_v60 = vsel %vm4754_vm2, %v5396_v6, %v5378_v15  ;;  %v5462_v15 = vld [vmem:[%s4709_s30 + $0x50] sm:$0x1]  ;;  %v5467_v48 = vrot.slane %v2436_v7, 5  ;;  %v5477_v6 = vld [vmem:[%s4709_s30 + $0x58] sm:$0xf] }
  0x9c   : > { %4140 = vmatmul.mubr.bf16.gmra.mrb[4].mxu0 %v4470_v35  ;;  %4030 = vmatpush3.bf16.msra.mxu1 %v4472_v11  ;;  %v5436_v21 = vrot.slane %v2361_v2, 4  ;;  %v2430_v11 = vshll.u32 %v3604_v56, 16  ;;  %v2395_v35 = vor.u32 %v2394_v5, %v5409_v8  ;;  %v2446_v42 = vshll.u32 %v5462_v15, 16 }
  0x9d   : > { %4156 = vmatpush3.bf16.msra.mxu0 %v4471_v39  ;;  %4143 = vmatprep.mubr.bf16.mxu0 %v4474_v50  ;;  %v2427_v39 = vshrl.u32 %v3604_v56, 16  ;;  %v2408_v50 = vrot.slane %v2406_v63, 5  ;;  %v2377_v2 = vsel %vm4754_vm2, %v5449_v61, %v5438_v62  ;;  %v2391_v63 = vsel %vm4754_vm2, %v2386_v41, %v5409_v8  ;;  %v5519_v61 = vld [vmem:[%s5821_s1 + $0x210] sm:$0xff]  }
  0x9e   : > { %4157 = vmatprep.subr.bf16.mxu0 %v4473_v38  ;;  %4031 = vmatprep.subr.bf16.mxu1 %v4475_v12  ;;  %v2432_v34 = vrot.slane %v2430_v11, 5  ;;  %v2396_v13 = vrot.slane %v2395_v35, 4  ;;  %v2367_v0 = vsel %vm4754_vm2, %v5436_v21, %v5391_v51  ;;  %v4490_v51 = vld [vmem:[%s4709_s30 + $0x24] sm:$0xff]   ;;  %v2464_v56 = vshrl.u32 %v5477_v6, 16 }
  0x9f   : > { %4016 = vmatmul.mubr.bf16.gmra.mrb[8].mxu1 %v3381_v57  ;;  %v2416_v57 = vshrl.u32 %v5402_v43, 16  ;;  %v2429_v14 = vrot.slane %v2427_v39, 4  ;;  %v2409_v59 = vor.u32 %v2408_v50, %v2405_v40  ;;  %v5512_v8 = vrot.slane %v2446_v42, 5  ;;  %v3613_v50 = vld [vmem:[%s4709_s30 + $0x6c] sm:$0xf] }
  0xa0   : > { %4032 = vmatpush3.bf16.msra.mxu1 %v4475_v12  ;;  %4019 = vmatprep.mubr.bf16.mxu1 %v3382_v20  ;;  %v2343_v20 = vsel %vm4754_vm2, %v5384_v23, %v5349_v49  ;;  %v4483_v49 = vld [vmem:[%s5821_s1 + $0x1f0] sm:$0xff]   ;;  %v5458_v12 = vrot.slane %v2412_v33, 5  ;;  %v4485_v23 = vld [vmem:[%s5821_s1 + $0x1f8] sm:$0xff]   ;;  %v5500_v33 = vrot.slane %v2422_v10, 5  ;;  %v2475_v21 = vshrl.u32 %v3610_v30, 16 }
  0xa1   : > { %4158 = vmatpush3.bf16.msra.mxu0 %v4473_v38  ;;  %4033 = vmatprep.subr.bf16.mxu1 %v4478_v16  ;;  %v5453_v38 = vrot.slane %v2398_v29, 5  ;;  %v2418_v18 = vrot.slane %v2416_v57, 4  ;;  %v3632_v17 = vcombine.low %v2343_v20, %v2353_v60  ;;  %v2460_v57 = vshll.u32 %v5477_v6, 16 }
  0xa2   : > { %4159 = vmatprep.subr.bf16.mxu0 %v4477_v58  ;;  %v2410_v20 = vrot.slane %v2409_v59, 4  ;;  %v2478_v62 = vshll.u32 %v3610_v30, 16  ;;  %v2484_v39 = vshll.u32 %v5494_v32, 16  ;;  %v2488_v11 = vshrl.u32 %v5494_v32, 16 }
  0xa3   : > { %v5524_v35 = vrot.slane %v2460_v57, 5  ;;  %v2499_v59 = vshrl.u32 %v3613_v50, 16 }
  0xa4   : > { %4144 = vmatmul.mubr.bf16.gmra.mrb[8].mxu0 %v4476_v19  ;;  %4034 = vmatpush3.bf16.msra.mxu1 %v4478_v16  ;;  %v2442_v16 = vrot.slane %v2440_v47, 4  ;;  %v4488_v19 = vld [vmem:[%s5821_s1 + $0x200] sm:$0xff]   ;;  %v2415_v41 = vsel %vm4754_vm2, %v2410_v20, %v5458_v12 }
  0xa5   : > { %4160 = vmatpush3.bf16.msra.mxu0 %v4477_v58  ;;  %4147 = vmatprep.mubr.bf16.mxu0 %v4480_v1  ;;  %v3607_v58 = vld [vmem:[%s4709_s30 + $0x54] sm:$0xf]  ;;  %v2433_v1 = vor.u32 %v2432_v34, %v2429_v14  ;;  %v2480_v14 = vrot.slane %v2478_v62, 5  ;;  %v5531_v34 = vrot.slane %v2484_v39, 5 }
  0xa6   : > { %4161 = vmatprep.subr.bf16.mxu0 %v4479_v54  ;;  %4035 = vmatprep.subr.bf16.mxu1 %v4481_v24  ;;  %v2443_v22 = vor.u32 %v2442_v16, %v5467_v48  ;;  %v2451_v5 = vshrl.u32 %v3607_v58, 16  ;;  %v2454_v29 = vshll.u32 %v3607_v58, 16  ;;  %v2490_v16 = vrot.slane %v2488_v11, 4  ;;  %v5541_v58 = vld [vmem:[%s4709_s30 + $0x68] sm:$0x1] }
  0xa7   : > { %4020 = vmatmul.mubr.bf16.gmra.mrb[12].mxu1 %v3383_v4  ;;  %v2419_v4 = vor.u32 %v2418_v18, %v5458_v12  ;;  %v2434_v7 = vrot.slane %v2433_v1, 4  ;;  %v5529_v18 = vld [vmem:[%s4709_s30 + $0x70] sm:$0xf]  ;;  %v5550_v12 = vld [vmem:[%s5821_s1 + $0x218] sm:$0xff]   ;;  %v2470_v1 = vshll.u32 %v5522_v53, 16 }
  0xa8   : > { %4036 = vmatpush3.bf16.msra.mxu1 %v4481_v24  ;;  %4039 = vmatprep.mubr.bf16.mxu1 %v4486_v52  ;;  %v2401_v24 = vsel %vm4754_vm2, %v2396_v13, %v5453_v38  ;;  %v2444_v47 = vrot.slane %v2443_v22, 4  ;;  %v3633_v52 = vcombine.low %v2367_v0, %v2377_v2  ;;  %v2466_v38 = vrot.slane %v2464_v56, 4  ;;  %v4494_v13 = vld [vmem:[%s4709_s30 + $0x3c] sm:$0xff]   ;;  %v3652_v11 = vld [vmem:[%s4709_s30 + $0x48] sm:$0xe] }
  0xa9   : > { %4162 = vmatpush3.bf16.msra.mxu0 %v4479_v54  ;;  %4037 = vmatprep.subr.bf16.mxu1 %v4484_v55  ;;  %v5507_v54 = vld [vmem:[%s5821_s1 + $0x208] sm:$0xff]   ;;  %v2420_v60 = vrot.slane %v2419_v4, 4  ;;  %v3634_v40 = vcombine.low %v2391_v63, %v2401_v24  ;;  %v2502_v4 = vshll.u32 %v3613_v50, 16  ;;  %v2508_v42 = vshll.u32 %v5529_v18, 16 }
  0xaa   : > { %4163 = vmatprep.subr.bf16.mxu0 %v4483_v49  ;;  %v2439_v0 = vsel %vm4754_vm2, %v2434_v7, %v5467_v48  ;;  %v2467_v2 = vor.u32 %v2466_v38, %v5524_v35  ;;  %v2472_v20 = vrot.slane %v2470_v1, 5  ;;  %v4495_v7 = vld [vmem:[%s4709_s30 + $0x48] sm:$0xff]  }
  0xab   : > { %v2504_v63 = vrot.slane %v2502_v4, 5  ;;  %v4497_v50 = vld [vmem:[%s5821_s1 + $0x228] sm:$0xff]  }
  0xac   : > { %4148 = vmatmul.mubr.bf16.gmra.mrb[12].mxu0 %v4482_v31  ;;  %4038 = vmatpush3.bf16.msra.mxu1 %v4484_v55  ;;  %v2456_v55 = vrot.slane %v2454_v29, 5  ;;  %v2477_v31 = vrot.slane %v2475_v21, 4  ;;  %v2494_v29 = vshll.u32 %v5541_v58, 16  ;;  %v2468_v24 = vrot.slane %v2467_v2, 4  ;;  %v4496_v21 = vld [vmem:[%s5821_s1 + $0x220] sm:$0xff]  }
  0xad   : > { %4164 = vmatpush3.bf16.msra.mxu0 %v4483_v49  ;;  %4167 = vmatprep.mubr.bf16.mxu0 %v3632_v17  ;;  %v2453_v49 = vrot.slane %v2451_v5, 4  ;;  %v4491_v17 = vld [vmem:[%s4709_s30 + $0x30] sm:$0xff]   ;;  %v2491_v5 = vor.u32 %v2490_v16, %v5531_v34  ;;  %v3654_v2 = vld [vmem:[%s4709_s30 + $0x60] sm:$0xe] }
  0xae   : > { %4165 = vmatprep.subr.bf16.mxu0 %v4485_v23  ;;  %4215 = vmatprep.subr.bf16.mxu1 %v4488_v19  ;;  %v2481_v22 = vor.u32 %v2480_v14, %v2477_v31  ;;  %v3660_v31 = vrot.slane %v3652_v11, 9 }
  0xaf   : > { %4040 = vmatmul.mubr.bf16.vlgmr.msra.gmra.mrb[0].mxu1 %v4487_v45  ;;  %v2457_v10 = vor.u32 %v2456_v55, %v2453_v49  ;;  %v2512_v45 = vshrl.u32 %v5529_v18, 16  ;;  %v2492_v39 = vrot.slane %v2491_v5, 4  ;;  %v4498_v49 = vld [vmem:[%s4709_s30 + $0x54] sm:$0xff]  }
  0xb0   : > { %4223 = vmatpush3.bf16.msra.mxu1 %v4488_v19  ;;  %4043 = vmatprep.mubr.bf16.mxu1 %v4490_v51  ;;  %v2501_v51 = vrot.slane %v2499_v59, 4  ;;  %v2482_v62 = vrot.slane %v2481_v22, 4 }
  0xb1   : > { %4166 = vmatpush3.bf16.msra.mxu0 %v4485_v23  ;;  %4216 = vmatprep.subr.bf16.mxu1 %v5507_v54  ;;  %v2425_v23 = vsel %vm4754_vm2, %v2420_v60, %v5500_v33  ;;  %v2458_v30 = vrot.slane %v2457_v10, 4  ;;  %v5565_v33 = vrot.slane %v2508_v42, 5  ;;  %v2514_v57 = vrot.slane %v2512_v45, 4  ;;  %v5570_v60 = vld [vmem:[%s4709_s30 + $0x74] sm:$0x1] }
  0xb2   : > { %4183 = vmatprep.subr.bf16.mxu0 %v4488_v19  ;;  %v3635_v48 = vcombine.low %v2415_v41, %v2425_v23  ;;  %v2505_v55 = vor.u32 %v2504_v63, %v2501_v51  ;;  %v2518_v38 = vshll.u32 %v5570_v60, 16  ;;  %v2487_v16 = vsel %vm4754_vm2, %v2482_v62, %v5531_v34  ;;  %v4501_v51 = vld [vmem:[%s5821_s1 + $0x238] sm:$0xff]  }
  0xb3   : > { %v2769_v10 = vrot.slane %v5331_v26, 5  ;;  %v3653_v26 = vld [vmem:[%s4709_s30 + $0x54] sm:$0xe]  ;;  %v2808_v45 = vrot.slane %v5494_v32, 5  ;;  %v2773_v63 = vrot.slane %v5352_v25, 5  ;;  %v2818_v3 = vrot.slane %v5570_v60, 5 }
  0xb4   : > { %4168 = vmatmul.mubr.bf16.vlgmr.msra.gmra.mrb[0].mxu0 %v3633_v52  ;;  %4224 = vmatpush3.bf16.msra.mxu1 %v5507_v54  ;;  %v2515_v52 = vor.u32 %v2514_v57, %v5565_v33  ;;  %v2520_v4 = vrot.slane %v2518_v38, 5  ;;  %v3662_v57 = vrot.slane %v3654_v2, 9 }
  0xb5   : > { %4184 = vmatpush3.bf16.msra.mxu0 %v4488_v19  ;;  %4171 = vmatprep.mubr.bf16.mxu0 %v3634_v40  ;;  %v2449_v19 = vsel %vm4754_vm2, %v2444_v47, %v5512_v8  ;;  %v2794_v8 = vrot.slane %v5420_v44, 5  ;;  %v2766_v47 = vrot.slane %v5326_v9, 5  ;;  %v2463_v44 = vsel %vm4754_vm2, %v2458_v30, %v5524_v35  ;;  %v3648_v40 = vld [vmem:[%s4709_s30 + $0x18] sm:$0xe]  ;;  %v3649_v30 = vld [vmem:[%s4709_s30 + $0x24] sm:$0xe] }
  0xb6   : > { %4185 = vmatprep.subr.bf16.mxu0 %v5507_v54  ;;  %4217 = vmatprep.subr.bf16.mxu1 %v5519_v61  ;;  %v3636_v56 = vcombine.low %v2439_v0, %v2449_v19  ;;  %v2473_v9 = vsel %vm4754_vm2, %v2468_v24, %v2472_v20  ;;  %v2797_v35 = vrot.slane %v5462_v15, 5  ;;  %v3656_v41 = vrot.slane %v3648_v40, 9  ;;  %v4500_v0 = vld [vmem:[%s5821_s1 + $0x230] sm:$0xff]   ;;  %v4499_v19 = vld [vmem:[%s4709_s30 + $0x60] sm:$0xff]  }
  0xb7   : > { %4044 = vmatmul.mubr.bf16.gmra.mrb[4].mxu1 %v4491_v17  ;;  %v2796_v14 = vrot.slane %v2794_v8, 4  ;;  %v2801_v17 = vrot.slane %v5477_v6, 5  ;;  %v2768_v23 = vrot.slane %v2766_v47, 4  ;;  %v3637_v15 = vcombine.low %v2463_v44, %v2473_v9 }
  0xb8   : > { %4225 = vmatpush3.bf16.msra.mxu1 %v5519_v61  ;;  %4047 = vmatprep.mubr.bf16.mxu1 %v4494_v13  ;;  %v2506_v13 = vrot.slane %v2505_v55, 4  ;;  %v2516_v59 = vrot.slane %v2515_v52, 4  ;;  %v2795_v42 = vsel %vm5051_vm5, %v3660_v31, %v2794_v8  ;;  %v2767_v22 = vsel %vm5051_vm5, %v3656_v41, %v2766_v47  ;;  %v3650_v8 = vld [vmem:[%s4709_s30 + $0x30] sm:$0xe] }
  0xb9   : > { %4186 = vmatpush3.bf16.msra.mxu0 %v5507_v54  ;;  %4218 = vmatprep.subr.bf16.mxu1 %v5550_v12  ;;  %v2496_v54 = vrot.slane %v2494_v29, 5  ;;  %v2798_v6 = vsel %vm5051_vm5, %v2796_v14, %v2797_v35  ;;  %v2803_v1 = vrot.slane %v2801_v17, 4  ;;  %v2770_v5 = vsel %vm5051_vm5, %v2768_v23, %v2769_v10  ;;  %v3651_v14 = vld [vmem:[%s4709_s30 + $0x3c] sm:$0xe] }
  0xba   : > { %4187 = vmatprep.subr.bf16.mxu0 %v5519_v61  ;;  %v2511_v32 = vsel %vm4754_vm2, %v2506_v13, %v5565_v33  ;;  %v2521_v29 = vsel %vm4754_vm2, %v2516_v59, %v2520_v4  ;;  %v2811_v24 = vrot.slane %v5541_v58, 5  ;;  %v3657_v33 = vrot.slane %v3649_v30, 9 }
  0xbb   : > { %v3680_v62 = vcombine.low %v2767_v22, %v2770_v5  ;;  %v2815_v58 = vrot.slane %v5529_v18, 5  ;;  %v3658_v47 = vrot.slane %v3650_v8, 9  ;;  %v2782_v44 = vrot.slane %v2780_v36, 4 }
  0xbc   : > { %4172 = vmatmul.mubr.bf16.gmra.mrb[4].mxu0 %v3635_v48  ;;  %4226 = vmatpush3.bf16.msra.mxu1 %v5550_v12  ;;  %v3684_v48 = vcombine.low %v2795_v42, %v2798_v6  ;;  %v2774_v40 = vsel %vm5051_vm5, %v3657_v33, %v2773_v63  ;;  %v2790_v41 = vrot.slane %v5456_v27, 5 }
  0xbd   : > { %4188 = vmatpush3.bf16.msra.mxu0 %v5519_v61  ;;  %4175 = vmatprep.mubr.bf16.mxu0 %v3636_v56  ;;  %v2497_v61 = vsel %vm4754_vm2, %v2492_v39, %v2496_v54  ;;  %v2810_v56 = vrot.slane %v2808_v45, 4  ;;  %v2775_v39 = vrot.slane %v2773_v63, 4  ;;  %v2809_v54 = vsel %vm5051_vm5, %v3662_v57, %v2808_v45 }
  0xbe   : > { %4189 = vmatprep.subr.bf16.mxu0 %v5550_v12  ;;  %4219 = vmatprep.subr.bf16.mxu1 %v4496_v21  ;;  %v3638_v34 = vcombine.low %v2487_v16, %v2497_v61  ;;  %v2817_v38 = vrot.slane %v2815_v58, 4 }
  0xbf   : > { %4048 = vmatmul.mubr.bf16.gmra.mrb[8].mxu1 %v4495_v7  ;;  %v2812_v11 = vsel %vm5051_vm5, %v2810_v56, %v2811_v24  ;;  %v3655_v7 = vld [vmem:[%s4709_s30 + $0x6c] sm:$0xe]  ;;  %v2777_v9 = vsel %vm5051_vm5, %v2775_v39, %v2776_v46  ;;  %s5674_s30 = sand.u32 1, %s4592_s13  }
  0xc0   : > { %4227 = vmatpush3.bf16.msra.mxu1 %v4496_v21  ;;  %4051 = vmatprep.mubr.bf16.mxu1 %v4498_v49  ;;  %v2783_v49 = vrot.slane %v5394_v37, 5  ;;  %v3686_v18 = vcombine.low %v2809_v54, %v2812_v11  ;;  %v3663_v52 = vrot.slane %v3655_v7, 9  ;;  %v2781_v37 = vsel %vm5051_vm5, %v3658_v47, %v2780_v36  ;;  %s3301_s9 = sshll.u32 %s5674_s30, 6  ;;  %s3172_s25 = scalar_lea.sflag [#allocation3], %s5674_s30 }
  0xc1   : > { %4190 = vmatpush3.bf16.msra.mxu0 %v5550_v12  ;;  %4220 = vmatprep.subr.bf16.mxu1 %v4497_v50  ;;  %v2804_v12 = vrot.slane %v5522_v53, 5  ;;  %v3661_v53 = vrot.slane %v3653_v26, 9  ;;  %v3681_v60 = vcombine.low %v2774_v40, %v2777_v9  ;;  %v2819_v16 = vsel %vm5051_vm5, %v2817_v38, %v2818_v3  ;;  %s5689_s10 = scalar_lea.vmem [#allocation2], %s3301_s9 }
  0xc2   : > { %4191 = vmatprep.subr.bf16.mxu0 %v4496_v21  ;;  %v2784_v31 = vsel %vm5051_vm5, %v2782_v44, %v2783_v49  ;;  %v2816_v35 = vsel %vm5051_vm5, %v3663_v52, %v2815_v58  ;;  %s3190_s17 = sshll.u32 %s5689_s10, 4  ;;  %s5720_s17 = int_to_ptr.vmem [resolvable:$true] %s3190_s17 }
  0xc3   : > { %v2805_v20 = vsel %vm5051_vm5, %v2803_v1, %v2804_v12  ;;  %v2802_v25 = vsel %vm5051_vm5, %v3661_v53, %v2801_v17  ;;  %v3682_v61 = vcombine.low %v2781_v37, %v2784_v31  ;;  %v3687_v23 = vcombine.low %v2816_v35, %v2819_v16  ;;  %s4506_s26 = scalar_lea.vmem %s5720_s17, 1024  ;;  %p4513_p0 = scmp.lt.s32.totalorder %s5720_s17, %s4511_s28 }
  0xc4   : > { %4176 = vmatmul.mubr.bf16.gmra.mrb[8].mxu0 %v3637_v15  ;;  %4228 = vmatpush3.bf16.msra.mxu1 %v4497_v50  ;;  %v3685_v55 = vcombine.low %v2802_v25, %v2805_v20  ;;  %p4507_p11 = scmp.ne.s32.totalorder %s5720_s17, %s4506_s26  ;;  %p4514_p1 = scmp.lt.s32.totalorder %s4512_s29, %s4506_s26 }
  0xc5   : > { %4192 = vmatpush3.bf16.msra.mxu0 %v4496_v21  ;;  %4179 = vmatprep.mubr.bf16.mxu0 %v3638_v34  ;;  %v3639_v21 = vcombine.low %v2511_v32, %v2521_v29 }
  0xc6   : > { %4193 = vmatprep.subr.bf16.mxu0 %v4497_v50  ;;  %4221 = vmatprep.subr.bf16.mxu1 %v4500_v0  ;;  %p4508_p12 = pnand %p4507_p11, %p4664_p5  ;;  %p4515_p2 = por %p4514_p1, %p4513_p0 }
  0xc7   : > { %4052 = vmatmul.mubr.bf16.gmra.mrb[12].mxu1 %v4499_v19 }
  0xc8   : > { %4229 = vmatpush3.bf16.msra.mxu1 %v4500_v0  ;;  %4207 = vmatprep.mubr.bf16.mxu1 %v3684_v48  ;;  %p4509_p13 = pneg %p4508_p12 }
  0xc9   : > { %4194 = vmatpush3.bf16.msra.mxu0 %v4497_v50  ;;  %4222 = vmatprep.subr.bf16.mxu1 %v4501_v51  ;;  %v2787_v50 = vrot.slane %v5402_v43, 5  ;;  %v3659_v43 = vrot.slane %v3651_v14, 9 }
  0xca   : > { %4195 = vmatprep.subr.bf16.mxu0 %v4500_v0  ;;  %p4516_p3 = pnand %p4515_p2, %p4509_p13 }
  0xcb   : > { %v2789_v17 = vrot.slane %v2787_v50, 4  ;;  %v2788_v10 = vsel %vm5051_vm5, %v3659_v43, %v2787_v50 }
  0xcc   : > { %4180 = vmatmul.mubr.bf16.gmra.mrb[12].mxu0 %v3639_v21  ;;  %4230 = vmatpush3.bf16.msra.mxu1 %v4501_v51 }
  0xcd   : > { %4196 = vmatpush3.bf16.msra.mxu0 %v4500_v0  ;;  %4199 = vmatprep.mubr.bf16.mxu0 %v3680_v62  ;;  %v2791_v15 = vsel %vm5051_vm5, %v2789_v17, %v2790_v41 }
  0xce   : > { %4197 = vmatprep.subr.bf16.mxu0 %v4501_v51  ;;  %v3683_v13 = vcombine.low %v2788_v10, %v2791_v15 }
  0xcf   : > { %4208 = vmatmul.mubr.bf16.vlgmr.msra.gmra.mrb[16].mxu1 %v3685_v55 }
  0xd0   : > { %4211 = vmatprep.mubr.bf16.mxu1 %v3686_v18 }
  0xd1   : > { %4198 = vmatpush3.bf16.msra.mxu0 %v4501_v51 }
  0xd4   : > { %4200 = vmatmul.mubr.bf16.vlgmr.msra.gmra.mrb[0].mxu0 %v3681_v60 }
  0xd5   : > { %4203 = vmatprep.mubr.bf16.mxu0 %v3682_v61 }
  0xd7   : > { %4212 = vmatmul.mubr.bf16.gmra.mrb[20].mxu1 %v3687_v23 }
  0xdc   : > { %4204 = vmatmul.mubr.bf16.gmra.mrb[4].mxu0 %v3683_v13 }
 0x182   : > { %v4041_v59 = vpop.f32.mrb[0].mxu1 }
 0x183   : > { %v1260_v4 = vpop.f32.mrb[1].mxu1 }
 0x184   : > { %v4042_v34 = vpop.f32.mrb[2].mxu1 }
 0x185   : > { %v1263_v42 = vpop.f32.mrb[3].mxu1 }
 0x18a   : > { %v5665_v6 = vpop.f32.mrb[4].mxu1 }
 0x18b   : > { %v5667_v26 = vpop.f32.mrb[5].mxu1 }
 0x18c   : > { %v5669_v27 = vpop.f32.mrb[6].mxu1 }
 0x18d   : > { %v5671_v45 = vpop.f32.mrb[7].mxu1 }
 0x192   : > { %v4049_v0 = vpop.f32.mrb[8].mxu1 }
 0x193   : > { %v1292_v2 = vpop.f32.mrb[9].mxu1 }
 0x194   : > { %v4050_v1 = vpop.f32.mrb[10].mxu1 }
 0x195   : > { %v1295_v28 = vpop.f32.mrb[11].mxu1 }
 0x197   : > { %v4177_v12 = vpop.f32.mrb[8].mxu0 }
 0x198   : > { %v4239_v19 = vadd.f32 %v4177_v12, %v4049_v0  ;;  %v2685_v22 = vpop.f32.mrb[9].mxu0 }
 0x199   : > { %v4241_v5 = vadd.f32 %v2685_v22, %v1292_v2  ;;  %v4178_v32 = vpop.f32.mrb[10].mxu0 }
 0x19a   : > { %v4243_v29 = vadd.f32 %v4178_v32, %v4050_v1  ;;  %v2688_v48 = vpop.f32.mrb[11].mxu0  ;;  %v4053_v30 = vpop.f32.mrb[12].mxu1 }
 0x19b   : > { %v4245_v53 = vadd.f32 %v2688_v48, %v1295_v28  ;;  %v1308_v51 = vpop.f32.mrb[13].mxu1 }
 0x19c   : > { %v4054_v63 = vpop.f32.mrb[14].mxu1 }
 0x19d   : > { %v1311_v57 = vpop.f32.mrb[15].mxu1 }
 0x19f   : > { %v4181_v56 = vpop.f32.mrb[12].mxu0 }
 0x1a0   : > { %v4247_v24 = vadd.f32 %v4181_v56, %v4053_v30  ;;  %v2701_v36 = vpop.f32.mrb[13].mxu0 }
 0x1a1   : > { %v4249_v33 = vadd.f32 %v2701_v36, %v1308_v51  ;;  %v4182_v20 = vpop.f32.mrb[14].mxu0 }
 0x1a2   : > { %v4251_v8 = vadd.f32 %v4182_v20, %v4054_v63  ;;  %v2704_v21 = vpop.f32.mrb[15].mxu0  ;;  %v4209_v62 = vpop.f32.mrb[16].mxu1 }
 0x1a3   : > { %v4253_v25 = vadd.f32 %v2704_v21, %v1311_v57  ;;  %v5676_v58 = vadd.f32 %v4239_v19, %v4209_v62  ;;  %v2983_v39 = vpop.f32.mrb[17].mxu1 }
 0x1a4   : > { %v5679_v46 = vadd.f32 %v4241_v5, %v2983_v39  ;;  %v4210_v54 = vpop.f32.mrb[18].mxu1 }
 0x1a5   : > { %v5681_v11 = vadd.f32 %v4243_v29, %v4210_v54  ;;  %v2986_v7 = vpop.f32.mrb[19].mxu1 }
 0x1a6   : > { %v5683_v47 = vadd.f32 %v4245_v53, %v2986_v7 }
 0x1a7   : > { %v4201_v44 = vpop.f32.mrb[0].mxu0  ;;  %v3764_v49 = vpack.c.bf16 %v5681_v11, %v5676_v58 }
 0x1a8   : > { %v4231_v55 = vadd.f32 %v4201_v44, %v4041_v59  ;;  %v2951_v18 = vpop.f32.mrb[1].mxu0  ;;  %v3759_v52 = vpack.c.bf16 %v5683_v47, %v5679_v46 }
 0x1a9   : > { %v4232_v38 = vadd.f32 %v2951_v18, %v1260_v4  ;;  %v4202_v3 = vpop.f32.mrb[2].mxu0  ;;  %3780 = vst [vmem:[%s5689_s10 + $0x28] sm:$0xff] %v3764_v49  }
 0x1aa   : > { %v4233_v40 = vadd.f32 %v4202_v3, %v4042_v34  ;;  %v2954_v9 = vpop.f32.mrb[3].mxu0  ;;  %3779 = vst [vmem:[%s5689_s10 + $0x20] sm:$0xff] %v3759_v52   ;;  %v4213_v50 = vpop.f32.mrb[20].mxu1  ;;  %v3133_v13 = vmul.f32 %v4231_v55, %v4231_v55 }
 0x1ab   : > { %v4234_v37 = vadd.f32 %v2954_v9, %v1263_v42  ;;  %v5693_v31 = vadd.f32 %v4247_v24, %v4213_v50  ;;  %v2999_v14 = vpop.f32.mrb[21].mxu1  ;;  %v3131_v61 = vmul.f32 %v4232_v38, %v4232_v38 }
 0x1ac   : > { %v3744_v60 = vpack.c.bf16 %v4233_v40, %v4231_v55  ;;  %v5695_v35 = vadd.f32 %v4249_v33, %v2999_v14  ;;  %v4214_v16 = vpop.f32.mrb[22].mxu1  ;;  %v3134_v28 = vmul.f32 %v4233_v40, %v4233_v40 }
 0x1ad   : > { %v3739_v43 = vpack.c.bf16 %v4234_v37, %v4232_v38  ;;  %v3110_v17 = vadd.f32 %v4234_v37, %v4232_v38  ;;  %v3132_v41 = vmul.f32 %v4234_v37, %v4234_v37  ;;  %v3002_v23 = vpop.f32.mrb[23].mxu1  ;;  %v5698_v10 = vadd.f32 %v4251_v8, %v4214_v16 }
 0x1ae   : > { %3776 = vst [vmem:[%s5689_s10 + $0x8] sm:$0xff] %v3744_v60   ;;  %v5700_v15 = vadd.f32 %v4253_v25, %v3002_v23 }
 0x1af   : > { %3740 = vst [vmem:[%s5689_s10] sm:$0xff] %v3739_v43   ;;  %v3111_v59 = vadd.f32 %v4231_v55, %v3110_v17  ;;  %v3147_v4 = vadd.f32 %v3132_v41, %v3131_v61  ;;  %v4205_v34 = vpop.f32.mrb[4].mxu0  ;;  %v3774_v2 = vpack.c.bf16 %v5698_v10, %v5693_v31 }
 0x1b0   : > { %v4235_v42 = vadd.f32 %v4205_v34, %v5665_v6  ;;  %v2967_v0 = vpop.f32.mrb[5].mxu0  ;;  %v3769_v1 = vpack.c.bf16 %v5700_v15, %v5695_v35 }
 0x1b1   : > { %v3148_v12 = vadd.f32 %v3147_v4, %v3133_v13  ;;  %v4236_v19 = vadd.f32 %v2967_v0, %v5667_v26  ;;  %v3112_v22 = vadd.f32 %v4233_v40, %v3111_v59  ;;  %v4206_v5 = vpop.f32.mrb[6].mxu0  ;;  %3782 = vst [vmem:[%s5689_s10 + $0x38] sm:$0xff] %v3774_v2  }
 0x1b2   : > { %v4237_v32 = vadd.f32 %v4206_v5, %v5669_v27  ;;  %v2970_v6 = vpop.f32.mrb[7].mxu0  ;;  %3781 = vst [vmem:[%s5689_s10 + $0x30] sm:$0xff] %v3769_v1   ;;  %v3137_v56 = vmul.f32 %v4235_v42, %v4235_v42 }
 0x1b3   : > { %v3113_v29 = vadd.f32 %v4236_v19, %v3112_v22  ;;  %v3135_v48 = vmul.f32 %v4236_v19, %v4236_v19  ;;  %v3149_v30 = vadd.f32 %v3148_v12, %v3134_v28  ;;  %v4238_v53 = vadd.f32 %v2970_v6, %v5671_v45 }
 0x1b4   : > { %v3754_v51 = vpack.c.bf16 %v4237_v32, %v4235_v42 }
 0x1b5   : > { %v3150_v26 = vadd.f32 %v3149_v30, %v3135_v48  ;;  %v3749_v27 = vpack.c.bf16 %v4238_v53, %v4236_v19  ;;  %v3114_v63 = vadd.f32 %v4238_v53, %v3113_v29  ;;  %v3136_v57 = vmul.f32 %v4238_v53, %v4238_v53 }
 0x1b6   : > { %3778 = vst [vmem:[%s5689_s10 + $0x18] sm:$0xff] %v3754_v51  }
 0x1b7   : > { %3777 = vst [vmem:[%s5689_s10 + $0x10] sm:$0xff] %v3749_v27   ;;  %v3115_v45 = vadd.f32 %v4235_v42, %v3114_v63  ;;  %v3151_v24 = vadd.f32 %v3150_v26, %v3136_v57 }
 0x1b8   : > { %4519 = shalt.err (!%p4516_p3)
}
 0x1b9   : > { %s4520_s4 = scalar_lea.hbm %s5718_s24, 1024  ;;  %s4524_s7 = scalar_lea.hbm %s5822_s2, 4096 }
 0x1ba   : > { %p4521_p4 = scmp.ne.s32.totalorder %s5718_s24, %s4520_s4  ;;  %p4525_p9 = scmp.lt.u32.totalorder %s5718_s24, %s5822_s2 }
 0x1bb   : > { %p4526_p10 = scmp.lt.u32.totalorder %s4524_s7, %s4520_s4  ;;  %p4528_p12 = scmp.lt.u32.totalorder %s4520_s4, %s5718_s24 }
 0x1bc   : > { %p4522_p7 = pnand %p4521_p4, %p4664_p5 }
 0x1bd   : > { %p4527_p11 = por %p4526_p10, %p4525_p9 }
 0x1be   : > { %p4523_p8 = pneg %p4522_p7 }
 0x1bf   : > { %p4529_p13 = por %p4528_p12, %p4527_p11 }
 0x1c1   : > { %p4530_p0 = pnand %p4529_p13, %p4523_p8 }
 0x1c3   : > { %4533 = shalt.err (!%p4530_p0)
}
 0x1c4   : > { %s4603_s10 = smov 64   ;;  %s4604_s11 = smov 4   ;;  %v3138_v36 = vmul.f32 %v4237_v32, %v4237_v32  ;;  %v3116_v33 = vadd.f32 %v4237_v32, %v3115_v45  ;;  %v3152_v20 = vadd.f32 %v3151_v24, %v3137_v56  ;;  %v3139_v8 = vmul.f32 %v5679_v46, %v5679_v46 }
 0x1c5   : > { %4360 = dma.vmem_to_hbm [thread:$0]  (%p4664_p5), %s5720_s17, 1024, %s5718_s24, %s3172_s25, %s4603_s10, %s4603_s10, %s4604_s11   ;;  %v3140_v25 = vmul.f32 %v5683_v47, %v5683_v47  ;;  %v3141_v7 = vmul.f32 %v5676_v58, %v5676_v58  ;;  %v3142_v55 = vmul.f32 %v5681_v11, %v5681_v11  ;;  %v3144_v40 = vmul.f32 %v5700_v15, %v5700_v15 }
 0x1c6   : > { %v3117_v21 = vadd.f32 %v5679_v46, %v3116_v33  ;;  %v3153_v62 = vadd.f32 %v3152_v20, %v3138_v36  ;;  %v3143_v46 = vmul.f32 %v5695_v35, %v5695_v35  ;;  %v3145_v9 = vmul.f32 %v5693_v31, %v5693_v31  ;;  %s3302_s17 = sshll.u32 %s5674_s30, 1  ;;  %s3716_s19 = sshll.u32 %s4647_s16, 5 }
 0x1c7   : > { %v3146_v37 = vmul.f32 %v5698_v10, %v5698_v10  ;;  %s174_s20 = scalar_lea.vmem [#allocation4], %s3302_s17  ;;  %vm3168_vm6 = vcmask 1040384   ;;  %s5777_s27 = scalar_lea.hbm %s5823_s3, %s3716_s19 }
 0x1c8   : > { %v3154_v39 = vadd.f32 %v3153_v62, %v3139_v8  ;;  %v3118_v54 = vadd.f32 %v5683_v47, %v3117_v21  ;;  %s3206_s24 = sshll.u32 %s174_s20, 4  ;;  %s3177_s28 = scalar_lea.sflag [#allocation5], %s5674_s30  ;;  %s5779_s24 = int_to_ptr.vmem [resolvable:$true] %s3206_s24 }
 0x1c9   : > { %s4534_s29 = scalar_lea.vmem %s5779_s24, 32  ;;  %s4605_s16 = smov [#allocation4]  }
 0x1ca   : > { %v3119_v44 = vadd.f32 %v5676_v58, %v3118_v54  ;;  %v3155_v49 = vadd.f32 %v3154_v39, %v3140_v25  ;;  %p4535_p1 = scmp.ne.s32.totalorder %s5779_s24, %s4534_s29  ;;  %s4538_s4 = sshll.u32 %s4605_s16, 4  ;;  %s4539_s4 = int_to_ptr.vmem [resolvable:$false] %s4538_s4 }
 0x1cb   : > { %s4540_s5 = scalar_lea.vmem %s4539_s4, 64  ;;  %p4541_p4 = scmp.lt.s32.totalorder %s5779_s24, %s4539_s4 }
 0x1cc   : > { %v3120_v18 = vadd.f32 %v5681_v11, %v3119_v44  ;;  %v3156_v52 = vadd.f32 %v3155_v49, %v3141_v7  ;;  %p4536_p2 = pnand %p4535_p1, %p4664_p5  ;;  %p4542_p7 = scmp.lt.s32.totalorder %s4540_s5, %s4534_s29 }
 0x1ce   : > { %v3121_v38 = vadd.f32 %v5695_v35, %v3120_v18  ;;  %v3157_v3 = vadd.f32 %v3156_v52, %v3142_v55  ;;  %p4537_p3 = pneg %p4536_p2  ;;  %p4543_p8 = por %p4542_p7, %p4541_p4 }
 0x1d0   : > { %v3122_v47 = vadd.f32 %v5700_v15, %v3121_v38  ;;  %v3158_v58 = vadd.f32 %v3157_v3, %v3143_v46  ;;  %p4544_p9 = pnand %p4543_p8, %p4537_p3 }
 0x1d2   : > { %v3123_v50 = vadd.f32 %v5693_v31, %v3122_v47  ;;  %v3159_v11 = vadd.f32 %v3158_v58, %v3144_v40 }
 0x1d4   : > { %v3124_v14 = vadd.f32 %v5698_v10, %v3123_v50  ;;  %v3160_v60 = vadd.f32 %v3159_v11, %v3145_v9 }
 0x1d6   : > { %v3125_v35 = vrot.slane %v3124_v14, 4  ;;  %v3161_v16 = vadd.f32 %v3160_v60, %v3146_v37 }
 0x1d8   : > { %v3126_v61 = vadd.f32 %v3125_v35, %v3124_v14  ;;  %v3162_v43 = vrot.slane %v3161_v16, 4 }
 0x1da   : > { %v3127_v17 = vrot.slane %v3126_v61, 2  ;;  %v3163_v41 = vadd.f32 %v3162_v43, %v3161_v16 }
 0x1dc   : > { %v3128_v23 = vadd.f32 %v3127_v17, %v3126_v61  ;;  %v3164_v15 = vrot.slane %v3163_v41, 2 }
 0x1de   : > { %v3129_v13 = vrot.slane %v3128_v23, 1  ;;  %v3165_v31 = vadd.f32 %v3164_v15, %v3163_v41 }
 0x1e0   : > { %v3166_v59 = vrot.slane %v3165_v31, 1  ;;  %v3130_v10 = vadd.f32 %v3129_v13, %v3128_v23 }
 0x1e2   : > { %v3167_v4 = vadd.f32 %v3166_v59, %v3165_v31 }
 0x1e4   : > { %v3169_v34 = vsel %vm3168_vm6, %v3130_v10, %v3167_v4 }
 0x1e5   : > { %3170 = vst [vmem:[%s174_s20] sm:$0x3] %v3169_v34 }
 0x1e6   : > { %4547 = shalt.err (!%p4544_p9)
}
 0x1e7   : > { %s4548_s30 = scalar_lea.hbm %s5777_s27, 32  ;;  %s4552_s8 = scalar_lea.hbm %s5823_s3, 128 }
 0x1e8   : > { %p4549_p10 = scmp.ne.s32.totalorder %s5777_s27, %s4548_s30  ;;  %p4553_p13 = scmp.lt.u32.totalorder %s5777_s27, %s5823_s3 }
 0x1e9   : > { %p4554_p0 = scmp.lt.u32.totalorder %s4552_s8, %s4548_s30  ;;  %p4556_p2 = scmp.lt.u32.totalorder %s4548_s30, %s5777_s27 }
 0x1ea   : > { %p4550_p11 = pnand %p4549_p10, %p4664_p5 }
 0x1eb   : > { %p4555_p1 = por %p4554_p0, %p4553_p13 }
 0x1ec   : > { %p4551_p12 = pneg %p4550_p11 }
 0x1ed   : > { %p4557_p3 = por %p4556_p2, %p4555_p1 }
 0x1ef   : > { %p4558_p4 = pnand %p4557_p3, %p4551_p12 }
 0x1f1   : > { %4561 = shalt.err (!%p4558_p4)
}
 0x1f2   : > { %4361 = dma.vmem_to_hbm [thread:$0]  (%p4664_p5), %s5779_s24, 32, %s5777_s27, %s3177_s28  }
 0x1f3 PF: > { %p4371_p7 = scmp.ge.s32.totalorder %s4600_s15, 2  ;;  %s3218_s11 = sand.u32 1, %s4588_s12  }
 0x1f4   : > { %s3219_s17 = scalar_lea.sflag [#allocation3], %s3218_s11 }
 0x1f5   : > { %p4365_p8 = pnand %p4371_p7, %p4668_p6 }
 0x1f7   : > { %4579 = dma.done.wait (!%p4365_p8), %s3219_s17, 1024  }
 0x1f8   : > { %4581 = vsyncadd (!%p4365_p8), %s3219_s17, 4294966272  ;;  %s3228_s19 = scalar_lea.sflag [#allocation5], %s3218_s11 }
 0x1f9   : > { %4583 = dma.done.wait (!%p4365_p8), %s3228_s19, 32  }
 0x1fa   : > { %4585 = vsyncadd (!%p4365_p8), %s3228_s19, 4294967264  ;;  %p17_p5 = scmp.ge.s32.totalorder %s4651_s18, 6   ;;  %s5839_s12 = smov %s4592_s13 }
 0x1fb   : > { %s5840_s13 = smov %s4596_s14  ;;  %s5841_s14 = smov %s4662_s21 }
 0x1fc   : > { %s5842_s15 = smov %s4651_s18  ;;  %19 = sbr.rel (!%p17_p5) target bundleno = 5 (0x5), region = 90 }
 0x203   :  { %3233 = vsyncpa [#allocation3], 1 }
 0x204   :  { %3235 = vsyncpa [#allocation3 + $0x1], 1 }
 0x205   :  { %3236 = vsyncpa [#allocation5], 1 }
 0x206   :  { %3238 = vsyncpa [#allocation5 + $0x1], 1 }

</bundles_post_ra>
